<compile_context>
chip_gen: v6e
topology: v6e:2x2x1
jax: 0.10.0
libtpu: 0.0.40
codegen_flags: <defaults>
</compile_context>

<pallas_src>
import jax
import jax.numpy as jnp
from jax.experimental import pallas as pl
from jax.experimental.pallas import tpu as pltpu


# ------------------------------ fused kernel --------------------------------


def _make_fused_kernel(*, stride, TR, W, Wpad, Cin, hidden, oup,
                       has_expand, identity):
    """Fused expand -> dw3x3 -> project kernel for one (batch, row-tile) step."""
    TRin = TR * stride
    Wo = W // 2 if stride == 2 else W
    Rrows = TRin + 2 if stride == 1 else TRin + 1     # rows incl. halo row(s)

    def kernel(*refs):
        it = iter(refs)
        xtop_ref = next(it)                            # (1, 1, W, Cin)
        xmain_ref = next(it)                           # (1, TRin, W, Cin)
        xbot_ref = next(it) if stride == 1 else None   # (1, 1, W, Cin)
        we_ref = next(it) if has_expand else None      # (Cin, hidden) bf16 (BN folded)
        be_ref = next(it) if has_expand else None      # (1, hidden)   f32
        wd_ref = next(it)                              # (3, 3, hidden) f32 (BN folded)
        bd_ref = next(it)                              # (1, hidden)    f32
        wp_ref = next(it)                              # (hidden, oup) bf16 (BN folded)
        bp_ref = next(it)                              # (1, oup)      f32
        o_ref = next(it)                               # (1, TR, Wo, oup)
        if stride == 1:
            hbuf = next(it)                            # (TR+2, Wpad, hidden) f32
        else:
            hbuf_e = next(it)                          # (TR+1, Wpad, hidden) even rows
            hbuf_o = next(it)                          # (TR,   Wpad, hidden) odd rows

        r = pl.program_id(1)
        nr = pl.num_programs(1)

        # ---- 1) ONE fused (BN-folded) 1x1 expand over main rows + halo rows --
        parts = [xtop_ref[0], xmain_ref[0]]
        if stride == 1:
            parts.append(xbot_ref[0])
        xall = jnp.concatenate(parts, axis=0)          # (Rrows, W, Cin)
        if has_expand:
            x2d = xall.reshape(Rrows * W, Cin).astype(jnp.bfloat16)
            h = jnp.dot(x2d, we_ref[...], preferred_element_type=jnp.float32)
            h3 = jnp.clip(h + be_ref[...], 0.0, 6.0).reshape(Rrows, W, hidden)
        else:
            h3 = xall.astype(jnp.float32)              # hidden == Cin, no ReLU6

        # zero the out-of-image halo rows (top of first tile / bottom of last)
        ridx = jax.lax.broadcasted_iota(jnp.int32, (Rrows, 1, 1), 0)
        valid = (ridx > 0) | (r > 0)
        if stride == 1:
            valid = valid & ((ridx < Rrows - 1) | (r < nr - 1))
        h3 = jnp.where(valid, h3, 0.0)

        # ---- 2) write the hidden tile into VMEM scratch -----------------------
        # data occupies sublanes [0, W); [W, Wpad) stays zero and doubles as the
        # 3x3 left/right zero border (reached via pltpu.roll wrap-around below).
        if stride == 1:
            hbuf[:, 0:W, :] = h3
            hbuf[:, W:Wpad, :] = jnp.zeros((Rrows, Wpad - W, hidden), jnp.float32)
        else:
            # split rows by parity at write time so every depthwise tap reads a
            # contiguous leading-dim plane (no strided / whole-scratch loads).
            hm2 = h3[1:Rrows].reshape(TR, 2, W, hidden)
            hbuf_e[0:1, 0:W, :] = h3[0:1]
            hbuf_e[1:TR + 1, 0:W, :] = hm2[:, 1]
            hbuf_o[0:TR, 0:W, :] = hm2[:, 0]
            hbuf_e[:, W:Wpad, :] = jnp.zeros((TR + 1, Wpad - W, hidden), jnp.float32)
            hbuf_o[:, W:Wpad, :] = jnp.zeros((TR, Wpad - W, hidden), jnp.float32)

        # ---- 3) depthwise 3x3 (BN folded) + bias + ReLU6 ----------------------
        def rows_for_tap(kh):
            if stride == 1:
                return hbuf[kh:kh + TR, :, :]
            if kh == 0:
                return hbuf_e[0:TR, :, :]
            if kh == 1:
                return hbuf_o[0:TR, :, :]
            return hbuf_e[1:TR + 1, :, :]

        acc = jnp.zeros((TR, W, hidden), jnp.float32)
        for kh in range(3):
            rows = rows_for_tap(kh)                                 # (TR, Wpad, hidden)
            t_l = pltpu.roll(rows, shift=1, axis=1)[:, 0:W, :]          # in[w-1]
            t_c = rows[:, 0:W, :]                                        # in[w]
            t_r = pltpu.roll(rows, shift=Wpad - 1, axis=1)[:, 0:W, :]    # in[w+1]
            acc = (acc
                   + t_l * wd_ref[kh, 0, :]
                   + t_c * wd_ref[kh, 1, :]
                   + t_r * wd_ref[kh, 2, :])
        hdw = jnp.clip(acc + bd_ref[...], 0.0, 6.0)                 # (TR, W, hidden)

        # ---- 4) stride-2: keep even columns IN-KERNEL, before the projection --
        if stride == 2:
            # TODO(synk): parity-split the columns at scratch-write time too so
            # the depthwise loop itself only computes Wo columns.
            h_even = hdw.reshape(TR * Wo, 2, hidden)[:, 0:1, :]
            h2d = h_even.reshape(TR * Wo, hidden)
        else:
            h2d = hdw.reshape(TR * Wo, hidden)

        # ---- 5) 1x1 projection (BN folded, bf16 MXU) + bias (+ residual) ------
        y = jnp.dot(h2d.astype(jnp.bfloat16), wp_ref[...],
                    preferred_element_type=jnp.float32)
        y = y + bp_ref[...]
        if identity:                                   # stride == 1 and Cin == oup
            y = y + xall[1:1 + TR].reshape(TR * W, Cin).astype(jnp.float32)
        o_ref[0] = y.reshape(TR, Wo, oup).astype(o_ref.dtype)

    return kernel


# ------------------------------ wrapper --------------------------------------


def _round_up(v, m):
    return -(-v // m) * m


def _pick_row_tile(*, N, Ho, W, Wpad, Cin, hidden, oup, stride, x_bytes, budget):
    """Largest divisor of Ho whose estimated VMEM working set fits `budget`,
    preferring grids with >= 2 (and even) total parallel steps so the software
    pipeline always has work in flight and v7x's two TensorCores stay balanced."""
    Wo = W // 2 if stride == 2 else W
    fitting = []
    for tr in range(1, Ho + 1):
        if Ho % tr:
            continue
        trin = tr * stride
        scratch = 4 * (trin + 2) * Wpad * hidden                 # f32 hidden tile(s)
        inputs = 2 * x_bytes * (trin + 2) * W * Cin              # dbl-buffered in blocks
        outputs = 2 * x_bytes * tr * Wo * oup                    # dbl-buffered out block
        weights = 2 * (2 * Cin * hidden + 2 * hidden * oup
                       + 4 * (11 * hidden + oup))
        inflight = 4 * (trin + 4) * W * hidden                   # live vregs / spill room
        if scratch + inputs + outputs + weights + inflight <= budget:
            fitting.append(tr)
    if not fitting:
        return 1

    def steps(tr):
        return N * (Ho // tr)

    cands = [tr for tr in fitting if steps(tr) >= 2] or fitting
    even = [tr for tr in cands if steps(tr) % 2 == 0]            # v7x: 2 TCs balanced
    cands = even or cands
    return max(cands)


def fused_inverted_residual(x, p):
    """x: (N, H, W, Cin) NHWC.  p: BN-folded params.  Returns (N, Ho, Wo, oup)."""
    N, H, W, Cin = x.shape
    stride = p["stride"]
    hidden = p["hidden"]
    oup = p["oup"]
    has_expand = p["expand_ratio"] != 1
    identity = p["identity"]
    assert stride in (1, 2) and Cin == p["inp"]
    assert not (identity and stride != 1)
    if stride == 2:
        # TODO(synk): odd H/W with stride 2 would need a masked tail tile.
        assert H % 2 == 0 and W % 2 == 0, "stride-2 path requires even H and W"

    Ho = (H + 2 - 3) // stride + 1
    Wo = (W + 2 - 3) // stride + 1
    Wpad = _round_up(W + 2, 8)

    # Generation-aware VMEM budgeting (128 MiB on v5e/v6e, 64 MiB per TC on v7x).
    try:
        vmem_cap = int(pltpu.get_tpu_info().vmem_capacity_bytes)
    except Exception:
        vmem_cap = 64 * 1024 * 1024
    budget = vmem_cap // 4
    vmem_limit = int(min(vmem_cap * 0.7, vmem_cap - (16 << 20)))

    TR = _pick_row_tile(N=N, Ho=Ho, W=W, Wpad=Wpad, Cin=Cin, hidden=hidden,
                        oup=oup, stride=stride, x_bytes=x.dtype.itemsize,
                        budget=budget)
    TRin = TR * stride
    grid_r = Ho // TR
    assert Ho % TR == 0 and H % TRin == 0

    kernel = _make_fused_kernel(stride=stride, TR=TR, W=W, Wpad=Wpad, Cin=Cin,
                                hidden=hidden, oup=oup, has_expand=has_expand,
                                identity=identity)

    in_specs = [
        # one-row top halo (row r*TRin - 1, clamped; zero-masked when r == 0)
        pl.BlockSpec((1, 1, W, Cin),
                     lambda n, r: (n, jnp.maximum(r * TRin - 1, 0), 0, 0)),
        # the TRin main input rows of this tile
        pl.BlockSpec((1, TRin, W, Cin), lambda n, r: (n, r, 0, 0)),
    ]
    args = [x, x]
    if stride == 1:
        # one-row bottom halo (zero-masked on the last tile)
        in_specs.append(pl.BlockSpec(
            (1, 1, W, Cin),
            lambda n, r: (n, jnp.minimum((r + 1) * TRin, H - 1), 0, 0)))
        args.append(x)
    if has_expand:
        in_specs += [pl.BlockSpec((Cin, hidden), lambda n, r: (0, 0)),
                     pl.BlockSpec((1, hidden), lambda n, r: (0, 0))]
        args += [p["we"], p["be"]]
    in_specs += [pl.BlockSpec((3, 3, hidden), lambda n, r: (0, 0, 0)),
                 pl.BlockSpec((1, hidden), lambda n, r: (0, 0)),
                 pl.BlockSpec((hidden, oup), lambda n, r: (0, 0)),
                 pl.BlockSpec((1, oup), lambda n, r: (0, 0))]
    args += [p["wd"], p["bd"], p["wp"], p["bp"]]

    out_shape = jax.ShapeDtypeStruct((N, Ho, Wo, oup), x.dtype)
    out_spec = pl.BlockSpec((1, TR, Wo, oup), lambda n, r: (n, r, 0, 0))
    # TODO(synk): present a lane-dense (N, Ho, Wo*oup) output slab when oup < 128
    # to turn the masked vst.msk output stores into full-lane stores.

    if stride == 1:
        scratch = [pltpu.VMEM((TR + 2, Wpad, hidden), jnp.float32)]
    else:
        scratch = [pltpu.VMEM((TR + 1, Wpad, hidden), jnp.float32),
                   pltpu.VMEM((TR, Wpad, hidden), jnp.float32)]
    # TODO(synk): bf16 hidden scratch on v6e/v7x would halve scratch VMEM and
    # depthwise load bytes (keep f32 on v5e, which has no bf16 VALU).

    halo = 2 if stride == 1 else 1
    xb = x.dtype.itemsize
    flops = (2 * 9 * N * Ho * W * hidden              # depthwise (full width)
             + 2 * N * Ho * Wo * hidden * oup)        # projection
    if has_expand:
        flops += 2 * N * (H + halo * grid_r) * W * Cin * hidden
    bytes_accessed = (xb * N * (H + halo * grid_r) * W * Cin   # input + halo re-reads
                      + xb * N * Ho * Wo * oup                 # output
                      + (2 * Cin * hidden + 4 * hidden if has_expand else 0)
                      + 4 * 9 * hidden + 4 * hidden
                      + 2 * hidden * oup + 4 * oup)

    return pl.pallas_call(
        kernel,
        out_shape=out_shape,
        grid=(N, grid_r),
        in_specs=in_specs,
        out_specs=out_spec,
        scratch_shapes=scratch,
        compiler_params=pltpu.CompilerParams(
            dimension_semantics=("parallel", "parallel"),
            vmem_limit_bytes=vmem_limit),
        cost_estimate=pl.CostEstimate(flops=int(flops), transcendentals=0,
                                      bytes_accessed=int(bytes_accessed)),
    )(*args)


# -------------------- parameter init / BN folding / forward ------------------


def _bn_affine(key, c, eps=1e-5):
    k1, k2, k3, k4 = jax.random.split(key, 4)
    gamma = 1.0 + 0.1 * jax.random.normal(k1, (c,), jnp.float32)
    beta = 0.1 * jax.random.normal(k2, (c,), jnp.float32)
    mean = 0.1 * jax.random.normal(k3, (c,), jnp.float32)
    var = jnp.abs(jax.random.normal(k4, (c,), jnp.float32)) + 0.5
    scale = gamma / jnp.sqrt(var + eps)
    bias = beta - mean * scale
    return scale, bias


def init_inverted_residual(key, inp, oup, stride, expand_ratio):
    assert stride in (1, 2)
    hidden = round(inp * expand_ratio)
    keys = jax.random.split(key, 6)
    p = {"inp": inp, "oup": oup, "stride": stride,
         "expand_ratio": expand_ratio, "hidden": hidden,
         "identity": stride == 1 and inp == oup}
    if expand_ratio != 1:
        # PyTorch Conv2d weight (hidden, inp, 1, 1) -> matmul layout (inp, hidden)
        p["w_expand"] = 0.1 * jax.random.normal(keys[0], (inp, hidden), jnp.float32)
        p["bn1"] = _bn_affine(keys[1], hidden)
    # PyTorch depthwise weight (hidden, 1, 3, 3) -> (3, 3, hidden)
    p["w_dw"] = 0.1 * jax.random.normal(keys[2], (3, 3, hidden), jnp.float32)
    p["bn2"] = _bn_affine(keys[3], hidden)
    # PyTorch Conv2d weight (oup, hidden, 1, 1) -> (hidden, oup)
    p["w_proj"] = 0.1 * jax.random.normal(keys[4], (hidden, oup), jnp.float32)
    p["bn3"] = _bn_affine(keys[5], oup)
    return p


def fold_inverted_residual(p):
    """Fold eval-mode BN scales into the conv weights once; 1x1 weights go to
    bf16 for the MXU (in-kernel f32 accumulation preserves accuracy)."""
    # TODO(synk): training-mode BatchNorm (batch statistics + running-stat
    # updates) is not implemented; only eval-mode folded BN is supported.
    f = {k: p[k] for k in ("inp", "oup", "stride", "expand_ratio",
                           "hidden", "identity")}
    if p["expand_ratio"] != 1:
        s1, b1 = p["bn1"]
        f["we"] = (p["w_expand"] * s1[None, :]).astype(jnp.bfloat16)
        f["be"] = b1.reshape(1, -1)
    s2, b2 = p["bn2"]
    f["wd"] = p["w_dw"] * s2
    f["bd"] = b2.reshape(1, -1)
    s3, b3 = p["bn3"]
    f["wp"] = (p["w_proj"] * s3[None, :]).astype(jnp.bfloat16)
    f["bp"] = b3.reshape(1, -1)
    return f


def inverted_residual_forward(folded, x_nchw):
    # glue only: NCHW (PyTorch) <-> NHWC (TPU lanes = channels)
    x = jnp.transpose(x_nchw, (0, 2, 3, 1))
    out = fused_inverted_residual(x, folded)
    return jnp.transpose(out, (0, 3, 1, 2))


# ------------------------------ plain-JAX reference --------------------------


def reference_forward(p, x_nchw):
    x = jnp.transpose(x_nchw, (0, 2, 3, 1))
    h = x
    if p["expand_ratio"] != 1:
        s1, b1 = p["bn1"]
        h = jnp.einsum("nhwc,cd->nhwd", x, p["w_expand"])
        h = jnp.clip(h * s1 + b1, 0.0, 6.0)
    wdw = p["w_dw"].reshape(3, 3, 1, p["hidden"])
    h = jax.lax.conv_general_dilated(
        h, wdw, window_strides=(p["stride"], p["stride"]),
        padding=((1, 1), (1, 1)),
        dimension_numbers=("NHWC", "HWIO", "NHWC"),
        feature_group_count=p["hidden"])
    s2, b2 = p["bn2"]
    h = jnp.clip(h * s2 + b2, 0.0, 6.0)
    o = jnp.einsum("nhwc,cd->nhwd", h, p["w_proj"])
    s3, b3 = p["bn3"]
    o = o * s3 + b3
    if p["identity"]:
        o = o + x
    return jnp.transpose(o, (0, 3, 1, 2))


# ------------------------------------ main -----------------------------------


if __name__ == "__main__":
    key = jax.random.PRNGKey(0)
    N, H, W = 2, 16, 16
    configs = [
        dict(inp=32, oup=32, stride=1, expand_ratio=4),   # identity / residual path
        dict(inp=32, oup=64, stride=2, expand_ratio=6),   # stride-2 path
        dict(inp=32, oup=16, stride=1, expand_ratio=1),   # no-expand path
    ]
    for i, cfg in enumerate(configs):
        key, kx, kp = jax.random.split(key, 3)
        x = jax.random.normal(kx, (N, cfg["inp"], H, W), jnp.float32)  # NCHW
        raw = init_inverted_residual(kp, **cfg)
        folded = fold_inverted_residual(raw)

        out = jax.block_until_ready(inverted_residual_forward(folded, x))
        ref = reference_forward(raw, x)

        assert out.shape == ref.shape, (i, out.shape, ref.shape)
        max_err = float(jnp.max(jnp.abs(out - ref)))
        # bf16 MXU matmuls (f32 accumulation): ~1% relative error vs the
        # all-f32 reference is expected.
        assert jnp.allclose(out, ref, rtol=5e-2, atol=5e-2), (i, max_err)

        if i == 0:
            # bf16 storage end-to-end (halves HBM traffic) - smoke check.
            out_bf16 = jax.block_until_ready(
                inverted_residual_forward(folded, x.astype(jnp.bfloat16)))
            assert out_bf16.shape == ref.shape
            assert out_bf16.dtype == jnp.bfloat16
            assert bool(jnp.all(jnp.isfinite(out_bf16.astype(jnp.float32))))

    print("KERNEL_OK")
</pallas_src>

<mosaic_0001>
module attributes {stable_mosaic.version = 11 : i64} {
  func.func @kernel(%arg0: i32, %arg1: i32, %arg2: memref<1x1x16x32xf32, #tpu.memory_space<vmem>>, %arg3: memref<1x16x16x32xf32, #tpu.memory_space<vmem>>, %arg4: memref<1x1x16x32xf32, #tpu.memory_space<vmem>>, %arg5: memref<32x128xbf16, #tpu.memory_space<vmem>>, %arg6: memref<1x128xf32, #tpu.memory_space<vmem>>, %arg7: memref<3x3x128xf32, #tpu.memory_space<vmem>>, %arg8: memref<1x128xf32, #tpu.memory_space<vmem>>, %arg9: memref<128x32xbf16, #tpu.memory_space<vmem>>, %arg10: memref<1x32xf32, #tpu.memory_space<vmem>>, %arg11: memref<1x16x16x32xf32, #tpu.memory_space<vmem>>, %arg12: memref<18x24x128xf32, #tpu.memory_space<vmem>>) attributes {dimension_semantics = [#tpu.dimension_semantics<parallel>, #tpu.dimension_semantics<parallel>], iteration_bounds = array<i64: 2, 1>, scalar_prefetch = 0 : i64, scratch_operands = 1 : i64, tpu.core_type = #tpu.core_type<tc>, window_params = [{transform_indices = @transform_0, window_bounds = array<i64: 1, 1, 16, 32>}, {transform_indices = @transform_1, window_bounds = array<i64: 1, 16, 16, 32>}, {transform_indices = @transform_2, window_bounds = array<i64: 1, 1, 16, 32>}, {pipeline_mode = #tpu.pipeline_mode<synchronous>, transform_indices = @transform_3, window_bounds = array<i64: 32, 128>}, {pipeline_mode = #tpu.pipeline_mode<synchronous>, transform_indices = @transform_4, window_bounds = array<i64: 1, 128>}, {pipeline_mode = #tpu.pipeline_mode<synchronous>, transform_indices = @transform_5, window_bounds = array<i64: 3, 3, 128>}, {pipeline_mode = #tpu.pipeline_mode<synchronous>, transform_indices = @transform_6, window_bounds = array<i64: 1, 128>}, {pipeline_mode = #tpu.pipeline_mode<synchronous>, transform_indices = @transform_7, window_bounds = array<i64: 128, 32>}, {pipeline_mode = #tpu.pipeline_mode<synchronous>, transform_indices = @transform_8, window_bounds = array<i64: 1, 32>}, {transform_indices = @transform_9, window_bounds = array<i64: 1, 16, 16, 32>}]} {
    %c0 = arith.constant 0 : index
    %c0_0 = arith.constant 0 : index
    %c0_1 = arith.constant 0 : index
    %c0_2 = arith.constant 0 : index
    %0 = vector.load %arg2[%c0, %c0_0, %c0_1, %c0_2] : memref<1x1x16x32xf32, #tpu.memory_space<vmem>>, vector<1x1x16x32xf32>
    %1 = vector.shape_cast %0 : vector<1x1x16x32xf32> to vector<1x16x32xf32>
    %c0_3 = arith.constant 0 : index
    %c0_4 = arith.constant 0 : index
    %c0_5 = arith.constant 0 : index
    %c0_6 = arith.constant 0 : index
    %2 = vector.load %arg3[%c0_3, %c0_4, %c0_5, %c0_6] : memref<1x16x16x32xf32, #tpu.memory_space<vmem>>, vector<1x16x16x32xf32>
    %3 = vector.shape_cast %2 : vector<1x16x16x32xf32> to vector<16x16x32xf32>
    %c0_7 = arith.constant 0 : index
    %c0_8 = arith.constant 0 : index
    %c0_9 = arith.constant 0 : index
    %c0_10 = arith.constant 0 : index
    %4 = vector.load %arg4[%c0_7, %c0_8, %c0_9, %c0_10] : memref<1x1x16x32xf32, #tpu.memory_space<vmem>>, vector<1x1x16x32xf32>
    %5 = vector.shape_cast %4 : vector<1x1x16x32xf32> to vector<1x16x32xf32>
    %6 = tpu.concatenate %1, %3, %5 in 0 : vector<1x16x32xf32>, vector<16x16x32xf32>, vector<1x16x32xf32> -> vector<18x16x32xf32>
    %7 = vector.shape_cast %6 : vector<18x16x32xf32> to vector<288x32xf32>
    %8 = arith.truncf %7 : vector<288x32xf32> to vector<288x32xbf16>
    %c0_11 = arith.constant 0 : index
    %c0_12 = arith.constant 0 : index
    %9 = vector.load %arg5[%c0_11, %c0_12] : memref<32x128xbf16, #tpu.memory_space<vmem>>, vector<32x128xbf16>
    %cst = arith.constant dense<0.000000e+00> : vector<288x128xf32>
    %10 = tpu.matmul %8, %9, %cst {dimension_numbers = #tpu.dot_dimension_numbers<[1], [0], [0], [1], [0, 0, 1, 1], [], []>} : vector<288x32xbf16>, vector<32x128xbf16>, vector<288x128xf32> -> vector<288x128xf32>
    %c0_13 = arith.constant 0 : index
    %c0_14 = arith.constant 0 : index
    %11 = vector.load %arg6[%c0_13, %c0_14] : memref<1x128xf32, #tpu.memory_space<vmem>>, vector<1x128xf32>
    %12 = vector.broadcast %11 : vector<1x128xf32> to vector<288x128xf32>
    %13 = arith.addf %10, %12 : vector<288x128xf32>
    %cst_15 = arith.constant 0.000000e+00 : f32
    %cst_16 = arith.constant 6.000000e+00 : f32
    %14 = vector.broadcast %cst_15 : f32 to vector<288x128xf32>
    %15 = arith.maximumf %14, %13 : vector<288x128xf32>
    %16 = vector.broadcast %cst_16 : f32 to vector<288x128xf32>
    %17 = arith.minimumf %16, %15 : vector<288x128xf32>
    %18 = vector.shape_cast %17 : vector<288x128xf32> to vector<18x16x128xf32>
    %19 = tpu.iota {dimensions = array<i32: 0>} : vector<18x1x1xi32>
    %c0_i32 = arith.constant 0 : i32
    %20 = vector.broadcast %c0_i32 : i32 to vector<18x1x1xi32>
    %21 = arith.cmpi sgt, %19, %20 : vector<18x1x1xi32>
    %c0_i32_17 = arith.constant 0 : i32
    %22 = arith.cmpi sgt, %arg1, %c0_i32_17 : i32
    %23 = vector.broadcast %22 : i1 to vector<18x1x1xi1>
    %24 = arith.ori %21, %23 : vector<18x1x1xi1>
    %c17_i32 = arith.constant 17 : i32
    %25 = vector.broadcast %c17_i32 : i32 to vector<18x1x1xi32>
    %26 = arith.cmpi slt, %19, %25 : vector<18x1x1xi32>
    %c0_i32_18 = arith.constant 0 : i32
    %27 = arith.cmpi slt, %arg1, %c0_i32_18 : i32
    %28 = vector.broadcast %27 : i1 to vector<18x1x1xi1>
    %29 = arith.ori %26, %28 : vector<18x1x1xi1>
    %30 = arith.andi %24, %29 : vector<18x1x1xi1>
    %cst_19 = arith.constant 0.000000e+00 : f32
    %31 = vector.shape_cast %30 : vector<18x1x1xi1> to vector<18x1x1xi1>
    %32 = vector.broadcast %31 : vector<18x1x1xi1> to vector<18x16x128xi1>
    %33 = vector.broadcast %cst_19 : f32 to vector<18x16x128xf32>
    %34 = arith.select %32, %18, %33 : vector<18x16x128xi1>, vector<18x16x128xf32>
    %c0_20 = arith.constant 0 : index
    %c0_21 = arith.constant 0 : index
    %c0_22 = arith.constant 0 : index
    %35 = vector.load %arg12[%c0_20, %c0_21, %c0_22] : memref<18x24x128xf32, #tpu.memory_space<vmem>>, vector<18x16x128xf32>
    tpu.vector_store %arg12[%c0_20, %c0_21, %c0_22], %34 {strides = array<i32>} : memref<18x24x128xf32, #tpu.memory_space<vmem>>, vector<18x16x128xf32>,
    %cst_23 = arith.constant 0.000000e+00 : f32
    %36 = vector.broadcast %cst_23 : f32 to vector<18x8x128xf32>
    %c0_24 = arith.constant 0 : index
    %c16 = arith.constant 16 : index
    %c0_25 = arith.constant 0 : index
    %37 = vector.load %arg12[%c0_24, %c16, %c0_25] : memref<18x24x128xf32, #tpu.memory_space<vmem>>, vector<18x8x128xf32>
    tpu.vector_store %arg12[%c0_24, %c16, %c0_25], %36 {strides = array<i32>} : memref<18x24x128xf32, #tpu.memory_space<vmem>>, vector<18x8x128xf32>,
    %cst_26 = arith.constant 0.000000e+00 : f32
    %38 = vector.broadcast %cst_26 : f32 to vector<16x16x128xf32>
    %c0_27 = arith.constant 0 : index
    %c0_28 = arith.constant 0 : index
    %c0_29 = arith.constant 0 : index
    %39 = vector.load %arg12[%c0_27, %c0_28, %c0_29] : memref<18x24x128xf32, #tpu.memory_space<vmem>>, vector<16x24x128xf32>
    %c1_i32 = arith.constant 1 : i32
    %40 = tpu.dynamic_rotate %39 by %c1_i32 dim 1 : vector<16x24x128xf32>, i32 -> vector<16x24x128xf32>
    %41 = vector.extract_strided_slice %40 {offsets = [0, 0, 0], sizes = [16, 16, 128], strides = [1, 1, 1]} : vector<16x24x128xf32> to vector<16x16x128xf32>
    %42 = vector.extract_strided_slice %39 {offsets = [0, 0, 0], sizes = [16, 16, 128], strides = [1, 1, 1]} : vector<16x24x128xf32> to vector<16x16x128xf32>
    %c23_i32 = arith.constant 23 : i32
    %43 = tpu.dynamic_rotate %39 by %c23_i32 dim 1 : vector<16x24x128xf32>, i32 -> vector<16x24x128xf32>
    %44 = vector.extract_strided_slice %43 {offsets = [0, 0, 0], sizes = [16, 16, 128], strides = [1, 1, 1]} : vector<16x24x128xf32> to vector<16x16x128xf32>
    %c0_30 = arith.constant 0 : index
    %c0_31 = arith.constant 0 : index
    %c0_32 = arith.constant 0 : index
    %45 = vector.load %arg7[%c0_30, %c0_31, %c0_32] : memref<3x3x128xf32, #tpu.memory_space<vmem>>, vector<1x1x128xf32>
    %46 = vector.shape_cast %45 : vector<1x1x128xf32> to vector<128xf32>
    %47 = vector.shape_cast %46 : vector<128xf32> to vector<1x1x128xf32>
    %48 = vector.broadcast %47 : vector<1x1x128xf32> to vector<16x16x128xf32>
    %49 = arith.mulf %41, %48 : vector<16x16x128xf32>
    %50 = arith.addf %38, %49 : vector<16x16x128xf32>
    %c0_33 = arith.constant 0 : index
    %c1 = arith.constant 1 : index
    %c0_34 = arith.constant 0 : index
    %51 = vector.load %arg7[%c0_33, %c1, %c0_34] : memref<3x3x128xf32, #tpu.memory_space<vmem>>, vector<1x1x128xf32>
    %52 = vector.shape_cast %51 : vector<1x1x128xf32> to vector<128xf32>
    %53 = vector.shape_cast %52 : vector<128xf32> to vector<1x1x128xf32>
    %54 = vector.broadcast %53 : vector<1x1x128xf32> to vector<16x16x128xf32>
    %55 = arith.mulf %42, %54 : vector<16x16x128xf32>
    %56 = arith.addf %50, %55 : vector<16x16x128xf32>
    %c0_35 = arith.constant 0 : index
    %c2 = arith.constant 2 : index
    %c0_36 = arith.constant 0 : index
    %57 = vector.load %arg7[%c0_35, %c2, %c0_36] : memref<3x3x128xf32, #tpu.memory_space<vmem>>, vector<1x1x128xf32>
    %58 = vector.shape_cast %57 : vector<1x1x128xf32> to vector<128xf32>
    %59 = vector.shape_cast %58 : vector<128xf32> to vector<1x1x128xf32>
    %60 = vector.broadcast %59 : vector<1x1x128xf32> to vector<16x16x128xf32>
    %61 = arith.mulf %44, %60 : vector<16x16x128xf32>
    %62 = arith.addf %56, %61 : vector<16x16x128xf32>
    %c1_37 = arith.constant 1 : index
    %c0_38 = arith.constant 0 : index
    %c0_39 = arith.constant 0 : index
    %63 = vector.load %arg12[%c1_37, %c0_38, %c0_39] : memref<18x24x128xf32, #tpu.memory_space<vmem>>, vector<16x24x128xf32>
    %c1_i32_40 = arith.constant 1 : i32
    %64 = tpu.dynamic_rotate %63 by %c1_i32_40 dim 1 : vector<16x24x128xf32>, i32 -> vector<16x24x128xf32>
    %65 = vector.extract_strided_slice %64 {offsets = [0, 0, 0], sizes = [16, 16, 128], strides = [1, 1, 1]} : vector<16x24x128xf32> to vector<16x16x128xf32>
    %66 = vector.extract_strided_slice %63 {offsets = [0, 0, 0], sizes = [16, 16, 128], strides = [1, 1, 1]} : vector<16x24x128xf32> to vector<16x16x128xf32>
    %c23_i32_41 = arith.constant 23 : i32
    %67 = tpu.dynamic_rotate %63 by %c23_i32_41 dim 1 : vector<16x24x128xf32>, i32 -> vector<16x24x128xf32>
    %68 = vector.extract_strided_slice %67 {offsets = [0, 0, 0], sizes = [16, 16, 128], strides = [1, 1, 1]} : vector<16x24x128xf32> to vector<16x16x128xf32>
    %c1_42 = arith.constant 1 : index
    %c0_43 = arith.constant 0 : index
    %c0_44 = arith.constant 0 : index
    %69 = vector.load %arg7[%c1_42, %c0_43, %c0_44] : memref<3x3x128xf32, #tpu.memory_space<vmem>>, vector<1x1x128xf32>
    %70 = vector.shape_cast %69 : vector<1x1x128xf32> to vector<128xf32>
    %71 = vector.shape_cast %70 : vector<128xf32> to vector<1x1x128xf32>
    %72 = vector.broadcast %71 : vector<1x1x128xf32> to vector<16x16x128xf32>
    %73 = arith.mulf %65, %72 : vector<16x16x128xf32>
    %74 = arith.addf %62, %73 : vector<16x16x128xf32>
    %c1_45 = arith.constant 1 : index
    %c1_46 = arith.constant 1 : index
    %c0_47 = arith.constant 0 : index
    %75 = vector.load %arg7[%c1_45, %c1_46, %c0_47] : memref<3x3x128xf32, #tpu.memory_space<vmem>>, vector<1x1x128xf32>
    %76 = vector.shape_cast %75 : vector<1x1x128xf32> to vector<128xf32>
    %77 = vector.shape_cast %76 : vector<128xf32> to vector<1x1x128xf32>
    %78 = vector.broadcast %77 : vector<1x1x128xf32> to vector<16x16x128xf32>
    %79 = arith.mulf %66, %78 : vector<16x16x128xf32>
    %80 = arith.addf %74, %79 : vector<16x16x128xf32>
    %c1_48 = arith.constant 1 : index
    %c2_49 = arith.constant 2 : index
    %c0_50 = arith.constant 0 : index
    %81 = vector.load %arg7[%c1_48, %c2_49, %c0_50] : memref<3x3x128xf32, #tpu.memory_space<vmem>>, vector<1x1x128xf32>
    %82 = vector.shape_cast %81 : vector<1x1x128xf32> to vector<128xf32>
    %83 = vector.shape_cast %82 : vector<128xf32> to vector<1x1x128xf32>
    %84 = vector.broadcast %83 : vector<1x1x128xf32> to vector<16x16x128xf32>
    %85 = arith.mulf %68, %84 : vector<16x16x128xf32>
    %86 = arith.addf %80, %85 : vector<16x16x128xf32>
    %c2_51 = arith.constant 2 : index
    %c0_52 = arith.constant 0 : index
    %c0_53 = arith.constant 0 : index
    %87 = vector.load %arg12[%c2_51, %c0_52, %c0_53] : memref<18x24x128xf32, #tpu.memory_space<vmem>>, vector<16x24x128xf32>
    %c1_i32_54 = arith.constant 1 : i32
    %88 = tpu.dynamic_rotate %87 by %c1_i32_54 dim 1 : vector<16x24x128xf32>, i32 -> vector<16x24x128xf32>
    %89 = vector.extract_strided_slice %88 {offsets = [0, 0, 0], sizes = [16, 16, 128], strides = [1, 1, 1]} : vector<16x24x128xf32> to vector<16x16x128xf32>
    %90 = vector.extract_strided_slice %87 {offsets = [0, 0, 0], sizes = [16, 16, 128], strides = [1, 1, 1]} : vector<16x24x128xf32> to vector<16x16x128xf32>
    %c23_i32_55 = arith.constant 23 : i32
    %91 = tpu.dynamic_rotate %87 by %c23_i32_55 dim 1 : vector<16x24x128xf32>, i32 -> vector<16x24x128xf32>
    %92 = vector.extract_strided_slice %91 {offsets = [0, 0, 0], sizes = [16, 16, 128], strides = [1, 1, 1]} : vector<16x24x128xf32> to vector<16x16x128xf32>
    %c2_56 = arith.constant 2 : index
    %c0_57 = arith.constant 0 : index
    %c0_58 = arith.constant 0 : index
    %93 = vector.load %arg7[%c2_56, %c0_57, %c0_58] : memref<3x3x128xf32, #tpu.memory_space<vmem>>, vector<1x1x128xf32>
    %94 = vector.shape_cast %93 : vector<1x1x128xf32> to vector<128xf32>
    %95 = vector.shape_cast %94 : vector<128xf32> to vector<1x1x128xf32>
    %96 = vector.broadcast %95 : vector<1x1x128xf32> to vector<16x16x128xf32>
    %97 = arith.mulf %89, %96 : vector<16x16x128xf32>
    %98 = arith.addf %86, %97 : vector<16x16x128xf32>
    %c2_59 = arith.constant 2 : index
    %c1_60 = arith.constant 1 : index
    %c0_61 = arith.constant 0 : index
    %99 = vector.load %arg7[%c2_59, %c1_60, %c0_61] : memref<3x3x128xf32, #tpu.memory_space<vmem>>, vector<1x1x128xf32>
    %100 = vector.shape_cast %99 : vector<1x1x128xf32> to vector<128xf32>
    %101 = vector.shape_cast %100 : vector<128xf32> to vector<1x1x128xf32>
    %102 = vector.broadcast %101 : vector<1x1x128xf32> to vector<16x16x128xf32>
    %103 = arith.mulf %90, %102 : vector<16x16x128xf32>
    %104 = arith.addf %98, %103 : vector<16x16x128xf32>
    %c2_62 = arith.constant 2 : index
    %c2_63 = arith.constant 2 : index
    %c0_64 = arith.constant 0 : index
    %105 = vector.load %arg7[%c2_62, %c2_63, %c0_64] : memref<3x3x128xf32, #tpu.memory_space<vmem>>, vector<1x1x128xf32>
    %106 = vector.shape_cast %105 : vector<1x1x128xf32> to vector<128xf32>
    %107 = vector.shape_cast %106 : vector<128xf32> to vector<1x1x128xf32>
    %108 = vector.broadcast %107 : vector<1x1x128xf32> to vector<16x16x128xf32>
    %109 = arith.mulf %92, %108 : vector<16x16x128xf32>
    %110 = arith.addf %104, %109 : vector<16x16x128xf32>
    %c0_65 = arith.constant 0 : index
    %c0_66 = arith.constant 0 : index
    %111 = vector.load %arg8[%c0_65, %c0_66] : memref<1x128xf32, #tpu.memory_space<vmem>>, vector<1x128xf32>
    %112 = vector.shape_cast %111 : vector<1x128xf32> to vector<1x1x128xf32>
    %113 = vector.broadcast %112 : vector<1x1x128xf32> to vector<16x16x128xf32>
    %114 = arith.addf %110, %113 : vector<16x16x128xf32>
    %cst_67 = arith.constant 0.000000e+00 : f32
    %cst_68 = arith.constant 6.000000e+00 : f32
    %115 = vector.broadcast %cst_67 : f32 to vector<16x16x128xf32>
    %116 = arith.maximumf %115, %114 : vector<16x16x128xf32>
    %117 = vector.broadcast %cst_68 : f32 to vector<16x16x128xf32>
    %118 = arith.minimumf %117, %116 : vector<16x16x128xf32>
    %119 = vector.shape_cast %118 : vector<16x16x128xf32> to vector<256x128xf32>
    %120 = arith.truncf %119 : vector<256x128xf32> to vector<256x128xbf16>
    %c0_69 = arith.constant 0 : index
    %c0_70 = arith.constant 0 : index
    %121 = vector.load %arg9[%c0_69, %c0_70] : memref<128x32xbf16, #tpu.memory_space<vmem>>, vector<128x32xbf16>
    %cst_71 = arith.constant dense<0.000000e+00> : vector<256x32xf32>
    %122 = tpu.matmul %120, %121, %cst_71 {dimension_numbers = #tpu.dot_dimension_numbers<[1], [0], [0], [1], [0, 0, 1, 1], [], []>} : vector<256x128xbf16>, vector<128x32xbf16>, vector<256x32xf32> -> vector<256x32xf32>
    %c0_72 = arith.constant 0 : index
    %c0_73 = arith.constant 0 : index
    %123 = vector.load %arg10[%c0_72, %c0_73] : memref<1x32xf32, #tpu.memory_space<vmem>>, vector<1x32xf32>
    %124 = vector.broadcast %123 : vector<1x32xf32> to vector<256x32xf32>
    %125 = arith.addf %122, %124 : vector<256x32xf32>
    %126 = vector.extract_strided_slice %6 {offsets = [1, 0, 0], sizes = [16, 16, 32], strides = [1, 1, 1]} : vector<18x16x32xf32> to vector<16x16x32xf32>
    %127 = vector.shape_cast %126 : vector<16x16x32xf32> to vector<256x32xf32>
    %128 = arith.addf %125, %127 : vector<256x32xf32>
    %129 = vector.shape_cast %128 : vector<256x32xf32> to vector<16x16x32xf32>
    %c0_74 = arith.constant 0 : index
    %c0_75 = arith.constant 0 : index
    %c0_76 = arith.constant 0 : index
    %c0_77 = arith.constant 0 : index
    %130 = vector.load %arg11[%c0_74, %c0_75, %c0_76, %c0_77] : memref<1x16x16x32xf32, #tpu.memory_space<vmem>>, vector<1x16x16x32xf32>
    %131 = vector.shape_cast %130 : vector<1x16x16x32xf32> to vector<16x16x32xf32>
    %132 = vector.shape_cast %129 : vector<16x16x32xf32> to vector<1x16x16x32xf32>
    tpu.vector_store %arg11[%c0_74, %c0_75, %c0_76, %c0_77], %132 {strides = array<i32>} : memref<1x16x16x32xf32, #tpu.memory_space<vmem>>, vector<1x16x16x32xf32>,
    return
  }
  func.func @transform_0(%arg0: i32, %arg1: i32) -> (i32, i32, i32, i32) {
    %c16_i32 = arith.constant 16 : i32
    %0 = arith.muli %arg1, %c16_i32 : i32
    %c1_i32 = arith.constant 1 : i32
    %1 = arith.subi %0, %c1_i32 : i32
    %c0_i32 = arith.constant 0 : i32
    %2 = arith.maxsi %1, %c0_i32 : i32
    %c0_i32_0 = arith.constant 0 : i32
    %c0_i32_1 = arith.constant 0 : i32
    %c0_i32_2 = arith.constant 0 : i32
    return %arg0, %2, %c0_i32_0, %c0_i32_1 : i32, i32, i32, i32
  }
  func.func @transform_1(%arg0: i32, %arg1: i32) -> (i32, i32, i32, i32) {
    %c0_i32 = arith.constant 0 : i32
    %c0_i32_0 = arith.constant 0 : i32
    %c0_i32_1 = arith.constant 0 : i32
    return %arg0, %arg1, %c0_i32, %c0_i32_0 : i32, i32, i32, i32
  }
  func.func @transform_2(%arg0: i32, %arg1: i32) -> (i32, i32, i32, i32) {
    %c1_i32 = arith.constant 1 : i32
    %0 = arith.addi %arg1, %c1_i32 : i32
    %c16_i32 = arith.constant 16 : i32
    %1 = arith.muli %0, %c16_i32 : i32
    %c15_i32 = arith.constant 15 : i32
    %2 = arith.minsi %1, %c15_i32 : i32
    %c0_i32 = arith.constant 0 : i32
    %c0_i32_0 = arith.constant 0 : i32
    %c0_i32_1 = arith.constant 0 : i32
    return %arg0, %2, %c0_i32, %c0_i32_0 : i32, i32, i32, i32
  }
  func.func @transform_3(%arg0: i32, %arg1: i32) -> (i32, i32) {
    %c0_i32 = arith.constant 0 : i32
    %c0_i32_0 = arith.constant 0 : i32
    %c0_i32_1 = arith.constant 0 : i32
    return %c0_i32, %c0_i32_0 : i32, i32
  }
  func.func @transform_4(%arg0: i32, %arg1: i32) -> (i32, i32) {
    %c0_i32 = arith.constant 0 : i32
    %c0_i32_0 = arith.constant 0 : i32
    %c0_i32_1 = arith.constant 0 : i32
    return %c0_i32, %c0_i32_0 : i32, i32
  }
  func.func @transform_5(%arg0: i32, %arg1: i32) -> (i32, i32, i32) {
    %c0_i32 = arith.constant 0 : i32
    %c0_i32_0 = arith.constant 0 : i32
    %c0_i32_1 = arith.constant 0 : i32
    %c0_i32_2 = arith.constant 0 : i32
    return %c0_i32, %c0_i32_0, %c0_i32_1 : i32, i32, i32
  }
  func.func @transform_6(%arg0: i32, %arg1: i32) -> (i32, i32) {
    %c0_i32 = arith.constant 0 : i32
    %c0_i32_0 = arith.constant 0 : i32
    %c0_i32_1 = arith.constant 0 : i32
    return %c0_i32, %c0_i32_0 : i32, i32
  }
  func.func @transform_7(%arg0: i32, %arg1: i32) -> (i32, i32) {
    %c0_i32 = arith.constant 0 : i32
    %c0_i32_0 = arith.constant 0 : i32
    %c0_i32_1 = arith.constant 0 : i32
    return %c0_i32, %c0_i32_0 : i32, i32
  }
  func.func @transform_8(%arg0: i32, %arg1: i32) -> (i32, i32) {
    %c0_i32 = arith.constant 0 : i32
    %c0_i32_0 = arith.constant 0 : i32
    %c0_i32_1 = arith.constant 0 : i32
    return %c0_i32, %c0_i32_0 : i32, i32
  }
  func.func @transform_9(%arg0: i32, %arg1: i32) -> (i32, i32, i32, i32) {
    %c0_i32 = arith.constant 0 : i32
    %c0_i32_0 = arith.constant 0 : i32
    %c0_i32_1 = arith.constant 0 : i32
    return %arg0, %arg1, %c0_i32, %c0_i32_0 : i32, i32, i32, i32
  }
}

</mosaic_0001>

<bundles_post_ra>
// kernel: tpu_custom_call.1
= control target key start
LH: loop header
LB: loop body
LE: loop exit
PB: predicated region body
PF: predicated region fallthrough
CT: control target
= control target key end

     0   :  { %s5266_s0 = inlined_call_operand.hbm [shape: f32[2,16,16,32], index: 0, kind: input, shape index: {}]   ;;  %s5267_s1 = inlined_call_operand.hbm [shape: f32[2,16,16,32], index: 1, kind: input, shape index: {}]   ;;  %s5268_s2 = inlined_call_operand.hbm [shape: f32[2,16,16,32], index: 2, kind: input, shape index: {}]   ;;  %s5269_s3 = inlined_call_operand.vmem [shape: bf16[32,128], index: 3, kind: input, shape index: {}]   ;;  %s5270_s4 = inlined_call_operand.vmem [shape: f32[1,128], index: 4, kind: input, shape index: {}]   ;;  %s5271_s5 = inlined_call_operand.vmem [shape: f32[3,3,128], index: 5, kind: input, shape index: {}]   ;;  %s5272_s6 = inlined_call_operand.vmem [shape: f32[1,128], index: 6, kind: input, shape index: {}]   ;;  %s5273_s7 = inlined_call_operand.vmem [shape: bf16[128,32], index: 7, kind: input, shape index: {}]   ;;  %s5274_s8 = inlined_call_operand.vmem [shape: f32[1,32], index: 8, kind: input, shape index: {}]   ;;  %s5275_s9 = inlined_call_operand.hbm [shape: f32[2,16,16,32], index: 9, kind: output, shape index: {}]  }
   0x1   :  { %5345 = sst [smem:[#allocation96_spill]] %s5267_s1 }
   0x2   :  { %5346 = sst [smem:[#allocation97_spill]] %s5275_s9 }
   0x3   :  { %14 = vsyncpa [#allocation4], 0 }
   0x4   :  { %16 = vsyncpa [#allocation4 + $0x1], 0 }
   0x5   :  { %17 = vsyncpa [#allocation7], 0 }
   0x6   :  { %19 = vsyncpa [#allocation7 + $0x1], 0 }
   0x7   :  { %20 = vsyncpa [#allocation5], 0 }
   0x8   :  { %22 = vsyncpa [#allocation5 + $0x1], 0  ;;  %s3376_s30 = smov 0   ;;  %s3378_s10 = smov 0  }
   0x9   :  { %s3380_s11 = smov 0   ;;  %s3382_s12 = smov 0  }
   0xa   :  { %s3384_s13 = smov 0   ;;  %s3386_s14 = smov 0  }
   0xb LB: > { %5347 = sst [smem:[#allocation13_spill]] %s3295_s30  ;;  %s3407_s15 = sadd.s32 4294967295, %s3315_s14   ;;  %s3315_s14 = sphi %s3386_s14, %s28_s14   ;;  %s3311_s13 = sphi %s3384_s13, %s5617_s13   ;;  %s3307_s12 = sphi %s3382_s12, %s5616_s12   ;;  %s3303_s11 = sphi %s3380_s11, %s5615_s11   ;;  %s3299_s10 = sphi %s3378_s10, %s5619_s10   ;;  %s3295_s30 = sphi %s3376_s30, %s5618_s30  }
   0xc   : > { %5348 = sst [smem:[#allocation14_spill]] %s3303_s11  ;;  %s2795_s16 = sadd.s32 4294967294, %s3315_s14  }
   0xd   : > { %5349 = sst [smem:[#allocation15_spill]] %s3311_s13  ;;  %s40_s17 = sadd.s32 1, %s3311_s13 }
   0xe   : > { %s57_s18 = sadd.s32 1, %s3303_s11  ;;  %p42_p0 = scmp.ge.s32.totalorder %s40_s17, 2 }
   0xf   : > { %p64_p1 = scmp.ne.s32.totalorder %s3303_s11, %s3299_s10  ;;  %p65_p2 = scmp.eq.s32.totalorder %s3315_s14, 0 }
  0x10   : > { %p70_p3 = scmp.ne.s32.totalorder %s3299_s10, %s3295_s30  ;;  %s5621_s17 = smov (%p42_p0, %s40_s17), 0 }
  0x11   : > { %5350 = sst [smem:[#allocation16_spill]] %s5621_s17  ;;  %p3419_p4 = por %p65_p2, %p64_p1 }
  0x12   : > { %p71_p5 = scmp.eq.s32.totalorder %s3407_s15, 0  ;;  %s52_s20 = ssub.s32 %s3311_s13, %s5621_s17 }
  0x13   : > { %p286_p6 = scmp.eq.s32.totalorder %s3407_s15, 1  ;;  %p55_p7 = scmp.eq.s32.totalorder %s52_s20, 0 }
  0x14   : > { %p3427_p8 = por %p71_p5, %p70_p3  ;;  %p292_p10 = scmp.eq.s32.totalorder %s2795_s16, 1 }
  0x15   : > { %p3431_p9 = por %p286_p6, %p64_p1  ;;  %p3039_p13 = scmp.lt.s32.totalorder %s3315_s14, 2 }
  0x16   : > { %s3436_s23 = scalar_select %p55_p7, %s3303_s11, %s57_s18  }
  0x17   : > { %s5353_s22 = scalar_select %p3431_p9, 1, 0 }
  0x18   : > { %5355 = sst [smem:[#allocation18_spill]] %s3436_s23  ;;  %p3438_p11 = por %p292_p10, %p70_p3 }
  0x19   : > { %5354 = sst [smem:[#allocation17_spill]] %s5353_s22  ;;  %s3445_s25 = sand.u32 1, %s3303_s11  }
  0x1a   : > { %s5356_s24 = scalar_select %p3438_p11, 1, 0 }
  0x1b   : > { %s3448_s26 = sshll.u32 %s3311_s13, 12  ;;  %p3452_p0 = pnand %p3039_p13, %p3419_p4 }
  0x1c   : > { %5357 = sst [smem:[#allocation19_spill]] %s5356_s24  ;;  %s357_s28 = sand.u32 1, %s3315_s14  }
  0x1d   : > { %s2801_s29 = sshll.u32 %s3445_s25, 8  ;;  %s5359_s1 = sld [smem:[#allocation96_spill]] }
  0x1e   : > { %s361_s17 = scalar_lea.vmem [#allocation6], %s2801_s29  ;;  %p2807_p1 = scmp.ge.s32.totalorder %s3315_s14, 1 }
  0x1f   : > { %s371_s23 = sshll.u32 %s361_s17, 4  ;;  %p406_p2 = scmp.lt.s32.totalorder %s3315_s14, 3  ;;  %s372_s23 = int_to_ptr.vmem [resolvable:$true] %s371_s23 }
  0x20   : > { %s3464_s13 = scalar_lea.sflag [#allocation7], %s357_s28  ;;  %p3149_p3 = pneg %p3452_p0 }
  0x21   : > { %s3160_s19 = scalar_lea.vmem %s372_s23, 4096  ;;  %s3317_s11 = smov [#allocation6]  }
  0x22   : > { %p3161_p4 = scmp.ne.s32.totalorder %s372_s23, %s3160_s19  ;;  %s3165_s24 = sshll.u32 %s3317_s11, 4  ;;  %s3166_s24 = int_to_ptr.vmem [resolvable:$false] %s3165_s24 }
  0x23   : > { %s370_s20 = scalar_lea.hbm %s5359_s1, %s3448_s26  ;;  %s3167_s16 = scalar_lea.vmem %s3166_s24, 8192 }
  0x24   : > { %p3163_p5 = pnand %p3161_p4, %p3149_p3  ;;  %p3168_p7 = scmp.lt.s32.totalorder %s372_s23, %s3166_s24 }
  0x25   : > { %p3169_p10 = scmp.lt.s32.totalorder %s3167_s16, %s3160_s19 }
  0x26   : > { %p3164_p6 = pneg %p3163_p5 }
  0x27   : > { %p3170_p13 = por %p3169_p10, %p3168_p7 }
  0x29   : > { %p3171_p12 = pnand %p3170_p13, %p3164_p6 }
  0x2b   : > { %3174 = shalt.err (!%p3171_p12)
}
  0x2c   : > { %s5284_s17 = smov 128   ;;  %s5286_s28 = smov 8  }
  0x2d   : > { %3031 = dma.hbm_to_vmem [thread:$0]  (!%p3452_p0), %s370_s20, 4096, %s372_s23, %s3464_s13, %s5284_s17, %s5284_s17, %s5286_s28  }
  0x2e   : > { %p3481_p4 = pnand %p2807_p1, %p406_p2  ;;  %s2798_s24 = sshll.u32 %s3445_s25, 4 }
  0x2f   : > { %s346_s19 = scalar_lea.hbm %s5266_s0, %s3448_s26  ;;  %s334_s16 = scalar_lea.vmem [#allocation3], %s2798_s24 }
  0x30   : > { %s347_s1 = sshll.u32 %s334_s16, 4  ;;  %s385_s30 = scalar_lea.vmem [#allocation8], %s2798_s24  ;;  %s348_s1 = int_to_ptr.vmem [resolvable:$true] %s347_s1 }
  0x31   : > { %s398_s9 = sshll.u32 %s385_s30, 4  ;;  %s331_s22 = scalar_lea.sflag [#allocation4], %s3445_s25  ;;  %s3490_s9 = int_to_ptr.vmem [resolvable:$true] %s398_s9 }
  0x32   : > { %s3188_s23 = scalar_lea.vmem %s348_s1, 256  ;;  %s3320_s20 = smov [#allocation3]  }
  0x33   : > { %p3189_p12 = scmp.ne.s32.totalorder %s348_s1, %s3188_s23  ;;  %s3193_s17 = sshll.u32 %s3320_s20, 4  ;;  %s3194_s17 = int_to_ptr.vmem [resolvable:$false] %s3193_s17 }
  0x34   : > { %s3195_s28 = scalar_lea.vmem %s3194_s17, 512  ;;  %p3196_p5 = scmp.lt.s32.totalorder %s348_s1, %s3194_s17 }
  0x35   : > { %p3191_p1 = pnand %p3189_p12, %p3149_p3  ;;  %p3197_p6 = scmp.lt.s32.totalorder %s3195_s28, %s3188_s23 }
  0x37   : > { %p3192_p2 = pneg %p3191_p1  ;;  %p3198_p7 = por %p3197_p6, %p3196_p5 }
  0x39   : > { %p3199_p10 = pnand %p3198_p7, %p3192_p2 }
  0x3b   : > { %3202 = shalt.err (!%p3199_p10)
}
  0x3c   : > { %s5361_s30 = smov 8   ;;  %s5362_s24 = smov 128  }
  0x3d   : > { %3028 = dma.hbm_to_vmem [thread:$0]  (!%p3452_p0), %s346_s19, 256, %s348_s1, %s331_s22, %s5362_s24, %s5362_s24, %s5361_s30  }
  0x3e   : > { %s2866_s25 = sadd.s32 3840, %s3448_s26  ;;  %s3216_s28 = scalar_lea.vmem %s3490_s9, 256 }
  0x3f   : > { %s397_s17 = scalar_lea.hbm %s5268_s2, %s2866_s25  ;;  %p3217_p13 = scmp.ne.s32.totalorder %s3490_s9, %s3216_s28 }
  0x40   : > { %s3321_s16 = smov [#allocation8]  }
  0x41   : > { %p3219_p12 = pnand %p3217_p13, %p3149_p3  ;;  %s3221_s23 = sshll.u32 %s3321_s16, 4  ;;  %s3222_s23 = int_to_ptr.vmem [resolvable:$false] %s3221_s23 }
  0x42   : > { %s3223_s20 = scalar_lea.vmem %s3222_s23, 512  ;;  %p3224_p2 = scmp.lt.s32.totalorder %s3490_s9, %s3222_s23 }
  0x43   : > { %p3220_p1 = pneg %p3219_p12  ;;  %p3225_p5 = scmp.lt.s32.totalorder %s3223_s20, %s3216_s28 }
  0x45   : > { %p3226_p6 = por %p3225_p5, %p3224_p2 }
  0x47   : > { %p3227_p7 = pnand %p3226_p6, %p3220_p1 }
  0x49   : > { %3230 = shalt.err (!%p3227_p7)
}
  0x4a   : > { %3034 = dma.hbm_to_vmem [thread:$0]  (!%p3452_p0), %s397_s17, 256, %s3490_s9, %s3464_s13, %s5362_s24, %s5362_s24, %s5361_s30  }
  0x4b   : > { %410 = sbr.rel (%p3481_p4) target bundleno = 744 (0x2e8), region = 56 }
  0x50   : > { %s3521_s1 = sand.u32 1, %s3299_s10  }
  0x51   : > { %s2808_s22 = sshll.u32 %s3521_s1, 4  ;;  %s413_s26 = scalar_lea.sflag [#allocation4], %s3521_s1 }
  0x52   : > { %s416_s27 = scalar_lea.vmem [#allocation3], %s2808_s22 }
  0x53   : > { %3282 = dma.done.wait (%p3427_p8), %s413_s26, 256  }
  0x54   : > { %3284 = vsyncadd (%p3427_p8), %s413_s26, 4294967040  ;;  %s421_s9 = sand.u32 1, %s3407_s15   ;;  %s2809_s13 = sshll.u32 %s3521_s1, 8 }
  0x55   : > { %s422_s11 = scalar_lea.sflag [#allocation7], %s421_s9  ;;  %s3535_s19 = scalar_lea.vmem [#allocation6], %s2809_s13 }
  0x56   : > { %3286 = dma.done.wait (%p3427_p8), %s422_s11, 4352  }
  0x57   : > { %3288 = vsyncadd (%p3427_p8), %s422_s11, 4294962944  ;;  %v3094_v0 = vld [vmem:[%s5269_s3 + $0x8] sm:$0xff]   ;;  %v3095_v1 = vld [vmem:[%s5269_s3] sm:$0xff]   ;;  %vm567_vm0 = vcmask 261120   ;;  %s434_s21 = scalar_lea.vmem [#allocation8], %s2808_s22  ;;  %s5084_s11 = scalar_lea.vmem [#allocation9], %s2809_s13 }
  0x58   : > { %2913 = vmatprep.subr.bf16.mxu0 %v3094_v0  ;;  %v490_v2 = vld [vmem:[%s416_s27] sm:$0xff]  ;;  %v491_v3 = vld [vmem:[%s416_s27 + $0x8] sm:$0xff]  ;;  %s2867_s13 = sshll.u32 %s3307_s12, 12  ;;  %s2658_s24 = sshll.u32 %s5084_s11, 4  ;;  %s5213_s24 = int_to_ptr.vmem [resolvable:$true] %s2658_s24 }
  0x59   : > { %2914 = vmatpush3.bf16.msra.mxu0 %v3094_v0  ;;  %v526_v4 = vpack.c.bf16 %v491_v3, %v490_v2  ;;  %v492_v5 = vld [vmem:[%s3535_s19] sm:$0xff]  ;;  %v493_v6 = vld [vmem:[%s3535_s19 + $0x8] sm:$0xff]  ;;  %v494_v7 = vld [vmem:[%s3535_s19 + $0x10] sm:$0xff]  ;;  %v3322_v0 = vmov 0.0   ;;  %s2642_s12 = scalar_lea.sflag [#allocation5], %s3521_s1  ;;  %s3231_s18 = scalar_lea.vmem %s5213_s24, 4096 }
  0x5a   : > { %2915 = vmatprep.subr.bf16.mxu0 %v3095_v1  ;;  %v495_v8 = vld [vmem:[%s3535_s19 + $0x18] sm:$0xff]  ;;  %v527_v9 = vpack.c.bf16 %v493_v6, %v492_v5  ;;  %v496_v11 = vld [vmem:[%s3535_s19 + $0x20] sm:$0xff]  ;;  %v497_v12 = vld [vmem:[%s3535_s19 + $0x28] sm:$0xff]  ;;  %v1069_v5 = vlaneseq  ;;  %p3232_p8 = scmp.ne.s32.totalorder %s5213_s24, %s3231_s18  ;;  %s3323_s17 = smov [#allocation9]  }
  0x5b   : > { %2917 = vmatprep.mubr.msk.bf16.mxu0 %vm567_vm0, %v526_v4  ;;  %v528_v10 = vpack.c.bf16 %v495_v8, %v494_v7  ;;  %v498_v13 = vld [vmem:[%s3535_s19 + $0x30] sm:$0xff]  ;;  %v499_v14 = vld [vmem:[%s3535_s19 + $0x38] sm:$0xff]  ;;  %v529_v15 = vpack.c.bf16 %v497_v12, %v496_v11  ;;  %v500_v17 = vld [vmem:[%s3535_s19 + $0x40] sm:$0xff]  ;;  %v3640_v7 = vrot.slane %v3322_v0, 1  ;;  %s3235_s28 = sshll.u32 %s3323_s17, 4  ;;  %s3236_s28 = int_to_ptr.vmem [resolvable:$false] %s3235_s28 }
  0x5c   : > { %v530_v16 = vpack.c.bf16 %v499_v14, %v498_v13  ;;  %v501_v18 = vld [vmem:[%s3535_s19 + $0x48] sm:$0xff]  ;;  %v502_v19 = vld [vmem:[%s3535_s19 + $0x50] sm:$0xff]  ;;  %v503_v20 = vld [vmem:[%s3535_s19 + $0x58] sm:$0xff]  ;;  %v3651_v12 = vshrl.u32 %v1069_v5, 7  ;;  %p3233_p0 = pnand %p3232_p8, %p3431_p9  ;;  %s3237_s16 = scalar_lea.vmem %s3236_s28, 8192 }
  0x5d   : > { %2916 = vmatpush3.bf16.msra.mxu0 %v3095_v1  ;;  %v531_v21 = vpack.c.bf16 %v501_v18, %v500_v17  ;;  %v532_v22 = vpack.c.bf16 %v503_v20, %v502_v19  ;;  %v504_v23 = vld [vmem:[%s3535_s19 + $0x60] sm:$0xff]  ;;  %v505_v24 = vld [vmem:[%s3535_s19 + $0x68] sm:$0xff]  ;;  %v506_v25 = vld [vmem:[%s3535_s19 + $0x70] sm:$0xff]  ;;  %v3623_v1 = vrot.slane %v3322_v0, 7  ;;  %p3238_p4 = scmp.lt.s32.totalorder %s5213_s24, %s3236_s28  ;;  %p3239_p10 = scmp.lt.s32.totalorder %s3237_s16, %s3231_s18 }
  0x5e   : > { %v507_v26 = vld [vmem:[%s3535_s19 + $0x78] sm:$0xff]  ;;  %v533_v27 = vpack.c.bf16 %v505_v24, %v504_v23  ;;  %v508_v29 = vld [vmem:[%s3535_s19 + $0x80] sm:$0xff]  ;;  %v509_v30 = vld [vmem:[%s3535_s19 + $0x88] sm:$0xff]  ;;  %vm1071_vm1 = vcmp.lt.s32.totalorder %v3651_v12, 1  ;;  %vm1152_vm2 = vcmp.lt.s32.totalorder %v3651_v12, 7  ;;  %p3234_p3 = pneg %p3233_p0 }
  0x5f   : > { %v534_v28 = vpack.c.bf16 %v507_v26, %v506_v25  ;;  %v510_v31 = vld [vmem:[%s3535_s19 + $0x90] sm:$0xff]  ;;  %v511_v32 = vld [vmem:[%s3535_s19 + $0x98] sm:$0xff]  ;;  %v535_v33 = vpack.c.bf16 %v509_v30, %v508_v29  ;;  %v512_v35 = vld [vmem:[%s3535_s19 + $0xa0] sm:$0xff]  ;;  %5363 = vst [vmem:[#allocation20_spill] sm:$0xff] %v3623_v1  ;;  %p3240_p13 = por %p3239_p10, %p3238_p4 }
  0x60   : > { %2918 = vmatmul.mubr.msk.bf16.vlgmr.msra.gmra.mxu0 %vm567_vm0, %v527_v9  ;;  %v536_v34 = vpack.c.bf16 %v511_v32, %v510_v31  ;;  %v513_v36 = vld [vmem:[%s3535_s19 + $0xa8] sm:$0xff]  ;;  %v514_v37 = vld [vmem:[%s3535_s19 + $0xb0] sm:$0xff]  ;;  %v515_v38 = vld [vmem:[%s3535_s19 + $0xb8] sm:$0xff] }
  0x61   : > { %2921 = vmatprep.mubr.msk.bf16.mxu0 %vm567_vm0, %v528_v10  ;;  %v537_v39 = vpack.c.bf16 %v513_v36, %v512_v35  ;;  %v538_v40 = vpack.c.bf16 %v515_v38, %v514_v37  ;;  %v516_v41 = vld [vmem:[%s3535_s19 + $0xc0] sm:$0xff]  ;;  %v517_v42 = vld [vmem:[%s3535_s19 + $0xc8] sm:$0xff]  ;;  %v518_v43 = vld [vmem:[%s3535_s19 + $0xd0] sm:$0xff]  ;;  %p3241_p12 = pnand %p3240_p13, %p3234_p3 }
  0x62   : > { %v519_v44 = vld [vmem:[%s3535_s19 + $0xd8] sm:$0xff]  ;;  %v539_v45 = vpack.c.bf16 %v517_v42, %v516_v41  ;;  %v520_v47 = vld [vmem:[%s3535_s19 + $0xe0] sm:$0xff]  ;;  %v521_v48 = vld [vmem:[%s3535_s19 + $0xe8] sm:$0xff] }
  0x63   : > { %v540_v46 = vpack.c.bf16 %v519_v44, %v518_v43  ;;  %v522_v49 = vld [vmem:[%s3535_s19 + $0xf0] sm:$0xff]  ;;  %v523_v50 = vld [vmem:[%s3535_s19 + $0xf8] sm:$0xff]  ;;  %v541_v51 = vpack.c.bf16 %v521_v48, %v520_v47  ;;  %v3098_v58 = vld [vmem:[%s5273_s7 + $0x28] sm:$0xff]  }
  0x64   : > { %v542_v52 = vpack.c.bf16 %v523_v50, %v522_v49  ;;  %v524_v53 = vld [vmem:[%s434_s21] sm:$0xff]  ;;  %v525_v54 = vld [vmem:[%s434_s21 + $0x8] sm:$0xff]  ;;  %s5610_s21 = sld [smem:[#allocation97_spill]] }
  0x65   : > { %v543_v55 = vpack.c.bf16 %v525_v54, %v524_v53  ;;  %v3096_v56 = vld [vmem:[%s5273_s7 + $0x38] sm:$0xff]   ;;  %v3097_v57 = vld [vmem:[%s5273_s7 + $0x30] sm:$0xff]   ;;  %v3099_v59 = vld [vmem:[%s5273_s7 + $0x20] sm:$0xff]  }
  0x66   : > { %2953 = vmatprep.subr.bf16.mxu0 %v3096_v56  ;;  %3001 = vmatprep.subr.bf16.mxu1 %v3096_v56  ;;  %v3100_v60 = vld [vmem:[%s5273_s7 + $0x18] sm:$0xff]   ;;  %v3101_v61 = vld [vmem:[%s5273_s7 + $0x10] sm:$0xff]   ;;  %v3102_v62 = vld [vmem:[%s5273_s7 + $0x8] sm:$0xff]  }
  0x67   : > { %2954 = vmatpush3.bf16.msra.mxu0 %v3096_v56  ;;  %3009 = vmatpush3.bf16.msra.mxu1 %v3096_v56  ;;  %v3103_v63 = vld [vmem:[%s5273_s7] sm:$0xff]   ;;  %v3713_v5 = vld [vmem:[%s5271_s5 + $0x8] ss:$0 sm:$0xff] }
  0x68   : > { %2922 = vmatmul.mubr.msk.bf16.gmra.mxu0 %vm567_vm0, %v529_v15  ;;  %2955 = vmatprep.subr.bf16.mxu0 %v3097_v57  ;;  %v3628_v2 = vld [vmem:[%s5271_s5] ss:$0 sm:$0xff]  ;;  %v3633_v3 = vld [vmem:[%s5271_s5 + $0x1] ss:$0 sm:$0xff]  ;;  %v3649_v11 = vld [vmem:[%s5271_s5 + $0x2] ss:$0 sm:$0xff] }
  0x69   : > { %2925 = vmatprep.mubr.msk.bf16.mxu0 %vm567_vm0, %v530_v16  ;;  %3002 = vmatprep.subr.bf16.mxu1 %v3097_v57  ;;  %v3638_v4 = vld [vmem:[%s5270_s4] ss:$0 sm:$0xff]  ;;  %v1190_v8 = vmul.f32 %v3628_v2, %v3623_v1  ;;  %v1259_v9 = vmul.f32 0.0, %v3633_v3  ;;  %v1328_v16 = vmul.f32 %v3649_v11, %v3640_v7  ;;  %v3671_v30 = vld [vmem:[%s5271_s5 + $0x5] ss:$0 sm:$0xff] }
  0x6a   : > { %v3681_v44 = vld [vmem:[%s5271_s5 + $0x6] ss:$0 sm:$0xff]  ;;  %s5211_s29 = scalar_lea.hbm %s5610_s21, %s2867_s13 }
  0x6b   : > { %2956 = vmatpush3.bf16.msra.mxu0 %v3097_v57  ;;  %3010 = vmatpush3.bf16.msra.mxu1 %v3097_v57  ;;  %v1291_v15 = vadd.f32 %v1259_v9, %v1190_v8 }
  0x6c   : > { %2957 = vmatprep.subr.bf16.mxu0 %v3098_v58  ;;  %3003 = vmatprep.subr.bf16.mxu1 %v3098_v58 }
  0x6d   : > { %v1360_v23 = vadd.f32 %v1328_v16, %v1291_v15 }
  0x6f   : > { %2958 = vmatpush3.bf16.msra.mxu0 %v3098_v58  ;;  %3011 = vmatpush3.bf16.msra.mxu1 %v3098_v58 }
  0x70   : > { %2926 = vmatmul.mubr.msk.bf16.gmra.mxu0 %vm567_vm0, %v531_v21  ;;  %2959 = vmatprep.subr.bf16.mxu0 %v3099_v59 }
  0x71   : > { %2929 = vmatprep.mubr.msk.bf16.mxu0 %vm567_vm0, %v532_v22  ;;  %3004 = vmatprep.subr.bf16.mxu1 %v3099_v59  ;;  %v3660_v22 = vld [vmem:[%s5271_s5 + $0x4] ss:$0 sm:$0xff] }
  0x73   : > { %2960 = vmatpush3.bf16.msra.mxu0 %v3099_v59  ;;  %3012 = vmatpush3.bf16.msra.mxu1 %v3099_v59  ;;  %v3706_v59 = vld [vmem:[%s5271_s5 + $0x9] ss:$0 sm:$0xff] }
  0x74   : > { %2961 = vmatprep.subr.bf16.mxu0 %v3100_v60  ;;  %3005 = vmatprep.subr.bf16.mxu1 %v3100_v60 }
  0x77   : > { %2962 = vmatpush3.bf16.msra.mxu0 %v3100_v60  ;;  %3013 = vmatpush3.bf16.msra.mxu1 %v3100_v60 }
  0x78   : > { %2930 = vmatmul.mubr.msk.bf16.gmra.mxu0 %vm567_vm0, %v533_v27  ;;  %2963 = vmatprep.subr.bf16.mxu0 %v3101_v61 }
  0x79   : > { %2933 = vmatprep.mubr.msk.bf16.mxu0 %vm567_vm0, %v534_v28  ;;  %3006 = vmatprep.subr.bf16.mxu1 %v3101_v61 }
  0x7b   : > { %2964 = vmatpush3.bf16.msra.mxu0 %v3101_v61  ;;  %3014 = vmatpush3.bf16.msra.mxu1 %v3101_v61 }
  0x7c   : > { %2965 = vmatprep.subr.bf16.mxu0 %v3102_v62  ;;  %3007 = vmatprep.subr.bf16.mxu1 %v3102_v62 }
  0x7f   : > { %2966 = vmatpush3.bf16.msra.mxu0 %v3102_v62  ;;  %3015 = vmatpush3.bf16.msra.mxu1 %v3102_v62 }
  0x80   : > { %2934 = vmatmul.mubr.msk.bf16.gmra.mxu0 %vm567_vm0, %v535_v33  ;;  %2967 = vmatprep.subr.bf16.mxu0 %v3103_v63 }
  0x81   : > { %2937 = vmatprep.mubr.msk.bf16.mxu0 %vm567_vm0, %v536_v34  ;;  %3008 = vmatprep.subr.bf16.mxu1 %v3103_v63 }
  0x83   : > { %2968 = vmatpush3.bf16.msra.mxu0 %v3103_v63  ;;  %3016 = vmatpush3.bf16.msra.mxu1 %v3103_v63 }
  0x88   : > { %2938 = vmatmul.mubr.msk.bf16.gmra.mxu0 %vm567_vm0, %v537_v39 }
  0x89   : > { %2941 = vmatprep.mubr.msk.bf16.mxu0 %vm567_vm0, %v538_v40 }
  0x90   : > { %2942 = vmatmul.mubr.msk.bf16.gmra.mxu0 %vm567_vm0, %v539_v45 }
  0x91   : > { %2945 = vmatprep.mubr.msk.bf16.mxu0 %vm567_vm0, %v540_v46 }
  0x98   : > { %2946 = vmatmul.mubr.msk.bf16.gmra.mxu0 %vm567_vm0, %v541_v51 }
  0x99   : > { %2949 = vmatprep.mubr.msk.bf16.mxu0 %vm567_vm0, %v542_v52 }
  0xa0   : > { %2950 = vmatmul.mubr.msk.bf16.gmra.mxu0 %vm567_vm0, %v543_v55 }
 0x120   : > { %v2919_v6 = vpop.f32.mrf.mxu0 }
 0x121   : > { %v665_v10 = vadd.f32 %v2919_v6, %v3638_v4 }
 0x122   : > { %v656_v13 = vpop.f32.mrf.mxu0 }
 0x123   : > { %v801_v14 = vmax.f32 %v665_v10, 0.0 }
 0x124   : > { %v2920_v17 = vpop.f32.mrf.mxu0 }
 0x125   : > { %v837_v18 = vmin.f32 %v801_v14, 6.0  ;;  %v668_v19 = vadd.f32 %v2920_v17, %v3638_v4 }
 0x126   : > { %v659_v20 = vpop.f32.mrf.mxu0 }
 0x127   : > { %v1022_v21 = vrot.slane %v837_v18, 7  ;;  %v802_v24 = vmax.f32 %v668_v19, 0.0  ;;  %v1261_v33 = vmul.f32 %v3633_v3, %v837_v18  ;;  %v1105_v36 = vrot.slane %v837_v18, 1 }
 0x128   : > { %v2923_v25 = vpop.f32.mrf.mxu0  ;;  %v1676_v42 = vmul.f32 %v3671_v30, %v837_v18 }
 0x129   : > { %v1089_v26 = vsel %vm1071_vm1, %v3623_v1, %v1022_v21  ;;  %v681_v27 = vadd.f32 %v2923_v25, %v3638_v4  ;;  %v838_v31 = vmin.f32 %v802_v24, 6.0 }
 0x12a   : > { %v1192_v28 = vmul.f32 %v3628_v2, %v1089_v26  ;;  %v1607_v29 = vmul.f32 %v3660_v22, %v1089_v26  ;;  %v672_v32 = vpop.f32.mrf.mxu0 }
 0x12b   : > { %v805_v34 = vmax.f32 %v681_v27, 0.0  ;;  %v673_v35 = vadd.f32 %v3638_v4, %v672_v32  ;;  %v1038_v38 = vrot.slane %v838_v31, 7  ;;  %v1121_v39 = vrot.slane %v838_v31, 1 }
 0x12c   : > { %v1639_v37 = vadd.f32 %v1607_v29, %v1360_v23  ;;  %v2924_v40 = vpop.f32.mrf.mxu0  ;;  %v1293_v41 = vadd.f32 %v1261_v33, %v1192_v28  ;;  %v1262_v43 = vmul.f32 %v3633_v3, %v838_v31  ;;  %v1677_v54 = vmul.f32 %v3671_v30, %v838_v31 }
 0x12d   : > { %v3683_v45 = vmin.f32 %v805_v34, 6.0  ;;  %v1073_v46 = vsel %vm1071_vm1, %v1022_v21, %v1038_v38  ;;  %v1154_v47 = vsel %vm1152_vm2, %v1121_v39, %v3640_v7  ;;  %v1170_v48 = vsel %vm1152_vm2, %v1105_v36, %v1121_v39 }
 0x12e   : > { %v803_v49 = vmax.f32 %v673_v35, 0.0  ;;  %v675_v50 = vpop.f32.mrf.mxu0  ;;  %v1193_v51 = vmul.f32 %v3628_v2, %v1073_v46  ;;  %v1330_v52 = vmul.f32 %v3649_v11, %v1170_v48  ;;  %v1608_v53 = vmul.f32 %v3660_v22, %v1073_v46 }
 0x12f   : > { %v3696_v55 = vadd.f32 %v1676_v42, %v1639_v37  ;;  %v1331_v56 = vmul.f32 %v3649_v11, %v1154_v47  ;;  %v3700_v57 = vmul.f32 %v3681_v44, %v1170_v48  ;;  %v1024_v58 = vrot.slane %v3683_v45, 7 }
 0x130   : > { %v2927_v60 = vpop.f32.mrf.mxu0  ;;  %v1294_v61 = vadd.f32 %v1262_v43, %v1193_v51  ;;  %v1640_v62 = vadd.f32 %v1608_v53, %v1360_v23  ;;  %v1746_v63 = vmul.f32 %v3681_v44, %v1154_v47  ;;  %v1107_v0 = vrot.slane %v3683_v45, 1 }
 0x131   : > { %v1362_v6 = vadd.f32 %v1330_v52, %v1293_v41  ;;  %v3718_v8 = vsel %vm1071_vm1, %v3623_v1, %v1024_v58  ;;  %v1265_v9 = vmul.f32 %v3633_v3, %v3683_v45  ;;  %v3722_v10 = vmin.f32 %v803_v49, 6.0 }
 0x132   : > { %v688_v13 = vpop.f32.mrf.mxu0  ;;  %v3724_v14 = vadd.f32 %v1331_v56, %v1294_v61  ;;  %v1709_v15 = vadd.f32 %v1677_v54, %v1640_v62  ;;  %v3728_v16 = vmul.f32 %v3671_v30, %v3683_v45  ;;  %v3732_v17 = vmul.f32 %v3706_v59, %v3683_v45 }
 0x133   : > { %v1196_v18 = vmul.f32 %v3628_v2, %v3718_v8  ;;  %v3738_v19 = vmul.f32 %v3713_v5, %v3718_v8  ;;  %v1023_v20 = vrot.slane %v3722_v10, 7  ;;  %v1263_v24 = vmul.f32 %v3633_v3, %v3722_v10 }
 0x134   : > { %5364 = vst [vmem:[#allocation21_spill] sm:$0xff] %v3728_v16  ;;  %v2928_v23 = vpop.f32.mrf.mxu0  ;;  %v1678_v25 = vmul.f32 %v3671_v30, %v3722_v10  ;;  %v684_v26 = vadd.f32 %v2924_v40, %v3638_v4  ;;  %v676_v27 = vadd.f32 %v3638_v4, %v675_v50  ;;  %v697_v29 = vadd.f32 %v2927_v60, %v3638_v4 }
 0x135   : > { %v3751_v28 = vsel %vm1071_vm1, %v3623_v1, %v1023_v20  ;;  %v689_v31 = vadd.f32 %v3638_v4, %v688_v13  ;;  %v700_v32 = vadd.f32 %v2928_v23, %v3638_v4  ;;  %v3761_v43 = vadd.f32 %v1746_v63, %v1709_v15 }
 0x136   : > { %v691_v33 = vpop.f32.mrf.mxu0  ;;  %v1194_v34 = vmul.f32 %v3628_v2, %v3751_v28  ;;  %v1609_v35 = vmul.f32 %v3660_v22, %v3751_v28  ;;  %v806_v36 = vmax.f32 %v684_v26, 0.0  ;;  %v804_v37 = vmax.f32 %v676_v27, 0.0 }
 0x137   : > { %v809_v38 = vmax.f32 %v697_v29, 0.0  ;;  %v807_v39 = vmax.f32 %v689_v31, 0.0  ;;  %v810_v40 = vmax.f32 %v700_v32, 0.0  ;;  %v692_v41 = vadd.f32 %v3638_v4, %v691_v33 }
 0x138   : > { %v2931_v42 = vpop.f32.mrf.mxu0  ;;  %v1641_v45 = vadd.f32 %v1609_v35, %v1362_v6  ;;  %v842_v46 = vmin.f32 %v806_v36, 6.0  ;;  %v3763_v47 = vmin.f32 %v804_v37, 6.0  ;;  %v3765_v48 = vadd.f32 %v1265_v9, %v1196_v18 }
 0x139   : > { %v3767_v49 = vadd.f32 %v1263_v24, %v1194_v34  ;;  %v3769_v50 = vmin.f32 %v809_v38, 6.0  ;;  %v3771_v51 = vmin.f32 %v807_v39, 6.0  ;;  %v3773_v56 = vmin.f32 %v810_v40, 6.0 }
 0x13a   : > { %v704_v52 = vpop.f32.mrf.mxu0  ;;  %v1040_v53 = vrot.slane %v842_v46, 7  ;;  %v1123_v54 = vrot.slane %v842_v46, 1  ;;  %v808_v60 = vmax.f32 %v692_v41, 0.0  ;;  %v3775_v61 = vadd.f32 %v1678_v25, %v1641_v45 }
 0x13b   : > { %5365 = vst [vmem:[#allocation22_spill] sm:$0xff] %v3769_v50  ;;  %5366 = vst [vmem:[#allocation23_spill] sm:$0xff] %v3773_v56  ;;  %v1266_v62 = vmul.f32 %v3633_v3, %v842_v46  ;;  %v3779_v63 = vmul.f32 %v3671_v30, %v842_v46  ;;  %v1039_v6 = vrot.slane %v3763_v47, 7  ;;  %v3796_v23 = vmul.f32 %v3706_v59, %v842_v46 }
 0x13c   : > { %v2932_v9 = vpop.f32.mrf.mxu0  ;;  %v3784_v13 = vsel %vm1071_vm1, %v1024_v58, %v1040_v53  ;;  %v3789_v15 = vsel %vm1152_vm2, %v1123_v54, %v3640_v7  ;;  %v3793_v18 = vsel %vm1152_vm2, %v1107_v0, %v1123_v54  ;;  %v1264_v26 = vmul.f32 %v3633_v3, %v3763_v47 }
 0x13d   : > { %5367 = vst [vmem:[#allocation24_spill] sm:$0xff] %v3779_v63  ;;  %v1197_v24 = vmul.f32 %v3628_v2, %v3784_v13  ;;  %v3802_v25 = vmul.f32 %v3649_v11, %v3793_v18  ;;  %v1335_v0 = vmul.f32 %v3649_v11, %v3789_v15  ;;  %v3811_v29 = vmul.f32 %v3713_v5, %v3784_v13 }
 0x13e   : > { %v707_v27 = vpop.f32.mrf.mxu0  ;;  %v3815_v31 = vsel %vm1071_vm1, %v1023_v20, %v1039_v6  ;;  %v1026_v32 = vrot.slane %v3769_v50, 7  ;;  %v1679_v36 = vmul.f32 %v3671_v30, %v3763_v47  ;;  %v1269_v39 = vmul.f32 %v3633_v3, %v3769_v50 }
 0x13f   : > { %v1298_v33 = vadd.f32 %v1266_v62, %v1197_v24  ;;  %v1195_v34 = vmul.f32 %v3628_v2, %v3815_v31  ;;  %v1610_v35 = vmul.f32 %v3660_v22, %v3815_v31  ;;  %v3834_v40 = vmul.f32 %v3671_v30, %v3769_v50 }
 0x140   : > { %v2935_v37 = vpop.f32.mrf.mxu0  ;;  %v3827_v38 = vsel %vm1071_vm1, %v3623_v1, %v1026_v32  ;;  %v3842_v53 = vmul.f32 %v3633_v3, %v3771_v51  ;;  %v3850_v24 = vmul.f32 %v3671_v30, %v3771_v51  ;;  %v1270_v46 = vmul.f32 %v3633_v3, %v3773_v56 }
 0x141   : > { %5368 = vst [vmem:[#allocation25_spill] sm:$0xff] %v3827_v38  ;;  %5369 = vst [vmem:[#allocation26_spill] sm:$0xff] %v3834_v40  ;;  %v1642_v41 = vadd.f32 %v1610_v35, %v3724_v14  ;;  %v1200_v45 = vmul.f32 %v3628_v2, %v3827_v38  ;;  %v3844_v62 = vadd.f32 %v1335_v0, %v1298_v33  ;;  %v1042_v14 = vrot.slane %v3773_v56, 7 }
 0x142   : > { %v720_v54 = vpop.f32.mrf.mxu0  ;;  %v3846_v6 = vadd.f32 %v1264_v26, %v1195_v34  ;;  %5371 = vst [vmem:[#allocation28_spill] sm:$0xff] %v3850_v24  ;;  %v3858_v21 = vmin.f32 %v808_v60, 6.0  ;;  %v713_v0 = vadd.f32 %v2931_v42, %v3638_v4  ;;  %v705_v33 = vadd.f32 %v3638_v4, %v704_v52 }
 0x143   : > { %5370 = vst [vmem:[#allocation27_spill] sm:$0xff] %v3844_v62  ;;  %v3853_v35 = vadd.f32 %v1679_v36, %v1642_v41  ;;  %v3862_v26 = vsel %vm1071_vm1, %v1026_v32, %v1042_v14  ;;  %v716_v34 = vadd.f32 %v2932_v9, %v3638_v4  ;;  %v3867_v36 = vadd.f32 %v1269_v39, %v1200_v45 }
 0x144   : > { %v2936_v58 = vpop.f32.mrf.mxu0  ;;  %5372 = vst [vmem:[#allocation29_spill] sm:$0xff] %v3862_v26  ;;  %v1201_v41 = vmul.f32 %v3628_v2, %v3862_v26  ;;  %v3873_v60 = vmul.f32 %v3671_v30, %v3773_v56  ;;  %v813_v32 = vmax.f32 %v713_v0, 0.0  ;;  %v811_v14 = vmax.f32 %v705_v33, 0.0 }
 0x145   : > { %5373 = vst [vmem:[#allocation30_spill] sm:$0xff] %v3867_v36  ;;  %v814_v50 = vmax.f32 %v716_v34, 0.0  ;;  %v708_v42 = vadd.f32 %v3638_v4, %v707_v27  ;;  %v729_v9 = vadd.f32 %v2935_v37, %v3638_v4  ;;  %v721_v39 = vadd.f32 %v3638_v4, %v720_v54 }
 0x146   : > { %5374 = vst [vmem:[#allocation31_spill] sm:$0xff] %v3873_v60  ;;  %v723_v40 = vpop.f32.mrf.mxu0  ;;  %v3877_v52 = vadd.f32 %v1270_v46, %v1201_v41  ;;  %v732_v45 = vadd.f32 %v2936_v58, %v3638_v4  ;;  %v3886_v60 = vmul.f32 %v3633_v3, %v3858_v21  ;;  %v3888_v20 = vmin.f32 %v813_v32, 6.0 }
 0x147   : > { %v3890_v0 = vmin.f32 %v811_v14, 6.0  ;;  %v3892_v33 = vmin.f32 %v814_v50, 6.0  ;;  %v3896_v27 = vmul.f32 %v3671_v30, %v3858_v21  ;;  %v812_v37 = vmax.f32 %v708_v42, 0.0 }
 0x148   : > { %5375 = vst [vmem:[#allocation32_spill] sm:$0xff] %v3877_v52  ;;  %v3882_v36 = vpop.f32.mrf.mxu0  ;;  %5376 = vst [vmem:[#allocation33_spill] sm:$0xff] %v3888_v20  ;;  %v817_v46 = vmax.f32 %v729_v9, 0.0  ;;  %v815_v54 = vmax.f32 %v721_v39, 0.0  ;;  %v1028_v34 = vrot.slane %v3888_v20, 7  ;;  %v818_v52 = vmax.f32 %v732_v45, 0.0 }
 0x149   : > { %5377 = vst [vmem:[#allocation34_spill] sm:$0xff] %v3890_v0  ;;  %5378 = vst [vmem:[#allocation35_spill] sm:$0xff] %v3892_v33  ;;  %v3903_v32 = vadd.f32 %v3638_v4, %v723_v40  ;;  %v1273_v50 = vmul.f32 %v3633_v3, %v3888_v20  ;;  %v3909_v14 = vmul.f32 %v3671_v30, %v3888_v20  ;;  %v1027_v42 = vrot.slane %v3890_v0, 7 }
 0x14a   : > { %5379 = vst [vmem:[#allocation36_spill] sm:$0xff] %v3896_v27  ;;  %v3898_v58 = vpop.f32.mrf.mxu0  ;;  %v3918_v45 = vsel %vm1071_vm1, %v3623_v1, %v1028_v34  ;;  %v1271_v40 = vmul.f32 %v3633_v3, %v3890_v0  ;;  %v3924_v41 = vmul.f32 %v3671_v30, %v3890_v0  ;;  %v1274_v27 = vmul.f32 %v3633_v3, %v3892_v33 }
 0x14b   : > { %5380 = vst [vmem:[#allocation37_spill] sm:$0xff] %v3909_v14  ;;  %5381 = vst [vmem:[#allocation38_spill] sm:$0xff] %v3918_v45  ;;  %v1044_v14 = vrot.slane %v3892_v33, 7  ;;  %v1204_v20 = vmul.f32 %v3628_v2, %v3918_v45  ;;  %v3932_v9 = vsel %vm1071_vm1, %v3623_v1, %v1027_v42  ;;  %v3949_v16 = vmin.f32 %v812_v37, 6.0 }
 0x14c   : > { %v3913_v39 = vpop.f32.mrf.mxu0  ;;  %5382 = vst [vmem:[#allocation39_spill] sm:$0xff] %v3924_v41  ;;  %5383 = vst [vmem:[#allocation40_spill] sm:$0xff] %v3932_v9  ;;  %v3941_v41 = vmul.f32 %v3660_v22, %v3918_v45  ;;  %v1202_v0 = vmul.f32 %v3628_v2, %v3932_v9  ;;  %v3953_v56 = vmul.f32 %v3660_v22, %v3932_v9 }
 0x14d   : > { %v3947_v63 = vsel %vm1071_vm1, %v1028_v34, %v1044_v14  ;;  %5386 = vst [vmem:[#allocation43_spill] sm:$0xff] %v3949_v16  ;;  %v3959_v45 = vmul.f32 %v3671_v30, %v3892_v33  ;;  %v3965_v38 = vadd.f32 %v1273_v50, %v1204_v20  ;;  %v1043_v14 = vrot.slane %v3949_v16, 7 }
 0x14e   : > { %v3937_v24 = vpop.f32.mrf.mxu0  ;;  %5384 = vst [vmem:[#allocation41_spill] sm:$0xff] %v3941_v41  ;;  %5385 = vst [vmem:[#allocation42_spill] sm:$0xff] %v3947_v63  ;;  %v1205_v62 = vmul.f32 %v3628_v2, %v3947_v63  ;;  %v3961_v41 = vmin.f32 %v817_v46, 6.0  ;;  %v3967_v34 = vadd.f32 %v1271_v40, %v1202_v0  ;;  %v3971_v37 = vmul.f32 %v3660_v22, %v3947_v63 }
 0x14f   : > { %5387 = vst [vmem:[#allocation44_spill] sm:$0xff] %v3953_v56  ;;  %5388 = vst [vmem:[#allocation45_spill] sm:$0xff] %v3959_v45  ;;  %v1272_v46 = vmul.f32 %v3633_v3, %v3949_v16  ;;  %v3984_v20 = vsel %vm1071_vm1, %v1027_v42, %v1043_v14  ;;  %v3988_v0 = vmul.f32 %v3671_v30, %v3949_v16  ;;  %v4002_v14 = vmin.f32 %v818_v52, 6.0 }
 0x150   : > { %5389 = vst [vmem:[#allocation46_spill] sm:$0xff] %v3961_v41  ;;  %v3963_v26 = vpop.f32.mrf.mxu0  ;;  %5390 = vst [vmem:[#allocation47_spill] sm:$0xff] %v3965_v38  ;;  %v3974_v56 = vadd.f32 %v1274_v27, %v1205_v62  ;;  %v1030_v45 = vrot.slane %v3961_v41, 7  ;;  %v3991_v27 = vmin.f32 %v815_v54, 6.0  ;;  %v1203_v50 = vmul.f32 %v3628_v2, %v3984_v20 }
 0x151   : > { %5391 = vst [vmem:[#allocation48_spill] sm:$0xff] %v3967_v34  ;;  %5392 = vst [vmem:[#allocation49_spill] sm:$0xff] %v3971_v37  ;;  %v1277_v42 = vmul.f32 %v3633_v3, %v3961_v41  ;;  %v4008_v62 = vmul.f32 %v3660_v22, %v3984_v20  ;;  %v4014_v37 = vmul.f32 %v3671_v30, %v3961_v41  ;;  %v1046_v38 = vrot.slane %v4002_v14, 7 }
 0x152   : > { %5393 = vst [vmem:[#allocation50_spill] sm:$0xff] %v3974_v56  ;;  %v3980_v33 = vpop.f32.mrf.mxu0  ;;  %5394 = vst [vmem:[#allocation51_spill] sm:$0xff] %v3984_v20  ;;  %v3998_v40 = vsel %vm1071_vm1, %v3623_v1, %v1030_v45  ;;  %v1029_v63 = vrot.slane %v3991_v27, 7  ;;  %v816_v41 = vmax.f32 %v3903_v32, 0.0  ;;  %v5413_v32 = vrot.slane %v3722_v10, 1 }
 0x153   : > { %5395 = vst [vmem:[#allocation52_spill] sm:$0xff] %v3988_v0  ;;  %5396 = vst [vmem:[#allocation53_spill] sm:$0xff] %v3991_v27  ;;  %v1208_v54 = vmul.f32 %v3628_v2, %v3998_v40  ;;  %v4017_v0 = vadd.f32 %v1272_v46, %v1203_v50  ;;  %v4021_v52 = vmul.f32 %v3660_v22, %v3998_v40 }
 0x154   : > { %5397 = vst [vmem:[#allocation54_spill] sm:$0xff] %v3998_v40  ;;  %5398 = vst [vmem:[#allocation55_spill] sm:$0xff] %v4002_v14  ;;  %v4004_v9 = vpop.f32.mrf.mxu0  ;;  %v1275_v46 = vmul.f32 %v3633_v3, %v3991_v27  ;;  %v4038_v50 = vmul.f32 %v3671_v30, %v3991_v27  ;;  %v1777_v16 = vadd.f32 %v3700_v57, %v3696_v55 }
 0x155   : > { %5399 = vst [vmem:[#allocation56_spill] sm:$0xff] %v4008_v62  ;;  %5400 = vst [vmem:[#allocation57_spill] sm:$0xff] %v4014_v37  ;;  %v4027_v20 = vadd.f32 %v1277_v42, %v1208_v54  ;;  %v4032_v37 = vsel %vm1071_vm1, %v3623_v1, %v1029_v63  ;;  %v1278_v54 = vmul.f32 %v3633_v3, %v4002_v14 }
 0x156   : > { %5401 = vst [vmem:[#allocation58_spill] sm:$0xff] %v4017_v0  ;;  %5402 = vst [vmem:[#allocation59_spill] sm:$0xff] %v4021_v52  ;;  %v4025_v62 = vpop.f32.mrf.mxu0  ;;  %v1206_v56 = vmul.f32 %v3628_v2, %v4032_v37  ;;  %v4044_v52 = vsel %vm1071_vm1, %v1030_v45, %v1046_v38  ;;  %v745_v38 = vadd.f32 %v3882_v36, %v3638_v4 }
 0x157   : > { %5403 = vst [vmem:[#allocation60_spill] sm:$0xff] %v4027_v20  ;;  %5404 = vst [vmem:[#allocation61_spill] sm:$0xff] %v4032_v37  ;;  %v4053_v20 = vmul.f32 %v3660_v22, %v4032_v37  ;;  %v4062_v45 = vmul.f32 %v3660_v22, %v4044_v52  ;;  %v4066_v42 = vmul.f32 %v3671_v30, %v4002_v14  ;;  %v5411_v37 = vrot.slane %v3763_v47, 1 }
 0x158   : > { %5405 = vst [vmem:[#allocation62_spill] sm:$0xff] %v4038_v50  ;;  %5406 = vst [vmem:[#allocation63_spill] sm:$0xff] %v4044_v52  ;;  %v4049_v40 = vpop.f32.mrf.mxu0  ;;  %v1209_v50 = vmul.f32 %v3628_v2, %v4044_v52  ;;  %v821_v14 = vmax.f32 %v745_v38, 0.0  ;;  %v2025_v57 = vmul.f32 %v3713_v5, %v3815_v31  ;;  %v2093_v31 = vmul.f32 %v3706_v59, %v3722_v10 }
 0x159   : > { %5407 = vst [vmem:[#allocation64_spill] sm:$0xff] %v4049_v40  ;;  %5408 = vst [vmem:[#allocation65_spill] sm:$0xff] %v4053_v20  ;;  %v1155_v20 = vsel %vm1152_vm2, %v5411_v37, %v3640_v7  ;;  %v5412_v27 = vmov %v5411_v37  ;;  %v2024_v40 = vmul.f32 %v3713_v5, %v3751_v28 }
 0x15a   : > { %5409 = vst [vmem:[#allocation66_spill] sm:$0xff] %v4062_v45  ;;  %5410 = vst [vmem:[#allocation67_spill] sm:$0xff] %v4066_v42  ;;  %v1171_v36 = vsel %vm1152_vm2, %v5413_v32, %v5412_v27  ;;  %v4079_v0 = vpop.f32.mrf.mxu0  ;;  %v4081_v45 = vadd.f32 %v1275_v46, %v1206_v56  ;;  %v4083_v52 = vadd.f32 %v1278_v54, %v1209_v50  ;;  %v4085_v42 = vmin.f32 %v816_v41, 6.0 }
 0x15b   : > { %v1747_v34 = vmul.f32 %v3681_v44, %v1171_v36  ;;  %v1748_v37 = vmul.f32 %v3681_v44, %v1155_v20  ;;  %v4098_v41 = vmul.f32 %v3649_v11, %v1171_v36  ;;  %v4101_v50 = vmul.f32 %v3649_v11, %v1155_v20 }
 0x15c   : > { %5414 = vst [vmem:[#allocation68_spill] sm:$0xff] %v4083_v52  ;;  %v4093_v27 = vpop.f32.mrf.mxu0  ;;  %v1045_v56 = vrot.slane %v4085_v42, 7  ;;  %v4103_v54 = vmin.f32 %v821_v14, 6.0  ;;  %v1276_v46 = vmul.f32 %v3633_v3, %v4085_v42  ;;  %v4119_v14 = vmul.f32 %v3671_v30, %v4085_v42 }
 0x15d   : > { %v1779_v38 = vadd.f32 %v1747_v34, %v3775_v61  ;;  %v1780_v55 = vadd.f32 %v1748_v37, %v3853_v35  ;;  %v2056_v52 = vadd.f32 %v2024_v40, %v1777_v16  ;;  %v2057_v16 = vadd.f32 %v2025_v57, %v3761_v43 }
 0x15e   : > { %5415 = vst [vmem:[#allocation69_spill] sm:$0xff] %v4103_v54  ;;  %v4109_v28 = vpop.f32.mrf.mxu0  ;;  %v4113_v32 = vsel %vm1071_vm1, %v1029_v63, %v1045_v56  ;;  %5417 = vst [vmem:[#allocation71_spill] sm:$0xff] %v4119_v14  ;;  %v1032_v35 = vrot.slane %v4103_v54, 7  ;;  %v2094_v63 = vmul.f32 %v3706_v59, %v3763_v47  ;;  %v4154_v43 = vmul.f32 %v3671_v30, %v4103_v54 }
 0x15f   : > { %5416 = vst [vmem:[#allocation70_spill] sm:$0xff] %v4113_v32  ;;  %v1207_v61 = vmul.f32 %v3628_v2, %v4113_v32  ;;  %v4130_v37 = vmul.f32 %v3660_v22, %v4113_v32  ;;  %v2058_v40 = vadd.f32 %v3738_v19, %v1779_v38  ;;  %v2059_v47 = vadd.f32 %v3811_v29, %v1780_v55 }
 0x160   : > { %v2951_v34 = vpop.f32.mrf.mxu0  ;;  %v4140_v10 = vsel %vm1071_vm1, %v3623_v1, %v1032_v35  ;;  %v1281_v19 = vmul.f32 %v3633_v3, %v4103_v54  ;;  %5421 = vst [vmem:[#allocation75_spill] sm:$0xff] %v4154_v43  ;;  %v737_v55 = vadd.f32 %v3638_v4, %v3898_v58  ;;  %v748_v57 = vadd.f32 %v3913_v39, %v3638_v4 }
 0x161   : > { %5418 = vst [vmem:[#allocation72_spill] sm:$0xff] %v4130_v37  ;;  %v4135_v14 = vadd.f32 %v1276_v46, %v1207_v61  ;;  %5420 = vst [vmem:[#allocation74_spill] sm:$0xff] %v4140_v10  ;;  %v2125_v34 = vadd.f32 %v2093_v31, %v2056_v52  ;;  %v4146_v37 = vld [vmem:[%s5271_s5 + $0xa] ss:$0 sm:$0xff]  ;;  %v2126_v46 = vadd.f32 %v2094_v63, %v2057_v16  ;;  %v4161_v52 = vld [vmem:[%s5272_s6] ss:$0 sm:$0xff] }
 0x162   : > { %v4148_v56 = vpop.f32.mrf.mxu0  ;;  %v2162_v38 = vmul.f32 %v4146_v37, %v1171_v36  ;;  %v2163_v29 = vmul.f32 %v4146_v37, %v1155_v20  ;;  %v740_v61 = vadd.f32 %v3638_v4, %v3937_v24  ;;  %v1212_v36 = vmul.f32 %v3628_v2, %v4140_v10 }
 0x163   : > { %5419 = vst [vmem:[#allocation73_spill] sm:$0xff] %v4135_v14  ;;  %v2127_v20 = vadd.f32 %v3732_v17, %v2058_v40  ;;  %v2128_v16 = vadd.f32 %v3796_v23, %v2059_v47  ;;  %v819_v54 = vmax.f32 %v737_v55, 0.0  ;;  %v822_v32 = vmax.f32 %v748_v57, 0.0 }
 0x164   : > { %v2952_v31 = vpop.f32.mrf.mxu0  ;;  %v2194_v63 = vadd.f32 %v2162_v38, %v2125_v34  ;;  %v2195_v43 = vadd.f32 %v2163_v29, %v2126_v46  ;;  %v820_v14 = vmax.f32 %v740_v61, 0.0  ;;  %v4175_v58 = vmul.f32 %v3660_v22, %v4140_v10 }
 0x165   : > { %v2164_v24 = vmul.f32 %v4146_v37, %v3793_v18  ;;  %v761_v34 = vadd.f32 %v3963_v26, %v3638_v4  ;;  %v4183_v40 = vmin.f32 %v819_v54, 6.0  ;;  %v4185_v23 = vmin.f32 %v822_v32, 6.0 }
 0x166   : > { %5422 = vst [vmem:[#allocation76_spill] sm:$0xff] %v4175_v58  ;;  %v2233_v39 = vadd.f32 %v4161_v52, %v2194_v63  ;;  %v2234_v17 = vadd.f32 %v4161_v52, %v2195_v43  ;;  %v2165_v47 = vmul.f32 %v4146_v37, %v3789_v15  ;;  %v4189_v46 = vadd.f32 %v1281_v19, %v1212_v36 }
 0x167   : > { %5423 = vst [vmem:[#allocation77_spill] sm:$0xff] %v4185_v23  ;;  %v4191_v29 = vmin.f32 %v820_v14, 6.0  ;;  %v2196_v55 = vadd.f32 %v2164_v24, %v2127_v20  ;;  %v1031_v61 = vrot.slane %v4183_v40, 7  ;;  %v825_v26 = vmax.f32 %v761_v34, 0.0 }
 0x168   : > { %5424 = vst [vmem:[#allocation78_spill] sm:$0xff] %v4189_v46  ;;  %v2265_v38 = vmax.f32 %v2233_v39, 0.0  ;;  %v2266_v57 = vmax.f32 %v2234_v17, 0.0  ;;  %v2197_v31 = vadd.f32 %v2165_v47, %v2128_v16  ;;  %v1279_v32 = vmul.f32 %v3633_v3, %v4183_v40 }
 0x169   : > { %v1048_v43 = vrot.slane %v4185_v23, 7  ;;  %v4201_v14 = vsel %vm1071_vm1, %v3623_v1, %v1031_v61  ;;  %v4205_v19 = vmul.f32 %v3671_v30, %v4183_v40  ;;  %v1282_v39 = vmul.f32 %v3633_v3, %v4185_v23 }
 0x16a   : > { %v2297_v63 = vmin.f32 %v2265_v38, 6.0  ;;  %v2298_v58 = vmin.f32 %v2266_v57, 6.0  ;;  %5425 = vst [vmem:[#allocation79_spill] sm:$0xff] %v4201_v14  ;;  %v1210_v20 = vmul.f32 %v3628_v2, %v4201_v14  ;;  %v1047_v24 = vrot.slane %v4191_v29, 7 }
 0x16b   : > { %5426 = vst [vmem:[#allocation80_spill] sm:$0xff] %v4205_v19  ;;  %v4212_v16 = vsel %vm1071_vm1, %v1032_v35, %v1048_v43  ;;  %v4219_v17 = vmul.f32 %v3660_v22, %v4201_v14  ;;  %v4225_v38 = vmul.f32 %v3671_v30, %v4185_v23  ;;  %v2236_v54 = vadd.f32 %v4161_v52, %v2197_v31 }
 0x16c   : > { %5427 = vst [vmem:[#allocation81_spill] sm:$0xff] %v4212_v16  ;;  %v2329_v34 = vpack.c.bf16 %v2298_v58, %v2297_v63  ;;  %v1213_v47 = vmul.f32 %v3628_v2, %v4212_v16  ;;  %v4227_v57 = vadd.f32 %v1279_v32, %v1210_v20  ;;  %v4231_v35 = vmul.f32 %v3660_v22, %v4212_v16 }
 0x16d   : > { %5428 = vst [vmem:[#allocation82_spill] sm:$0xff] %v4219_v17  ;;  %5429 = vst [vmem:[#allocation83_spill] sm:$0xff] %v4225_v38  ;;  %v4235_v58 = vsel %vm1071_vm1, %v1031_v61, %v1047_v24  ;;  %v1280_v32 = vmul.f32 %v3633_v3, %v4191_v29  ;;  %v2235_v20 = vadd.f32 %v4161_v52, %v2196_v55  ;;  %v4246_v38 = vmin.f32 %v825_v26, 6.0 }
 0x16e   : > { %5430 = vst [vmem:[#allocation84_spill] sm:$0xff] %v4227_v57  ;;  %5431 = vst [vmem:[#allocation85_spill] sm:$0xff] %v4231_v35  ;;  %2969 = vmatprep.mubr.bf16.mxu0 %v2329_v34  ;;  %v4238_v43 = vadd.f32 %v1282_v39, %v1213_v47  ;;  %v1211_v36 = vmul.f32 %v3628_v2, %v4235_v58  ;;  %v753_v61 = vadd.f32 %v3638_v4, %v3980_v33 }
 0x16f   : > { %5432 = vst [vmem:[#allocation86_spill] sm:$0xff] %v4235_v58  ;;  %v5434_v24 = vrot.slane %v3858_v21, 7  ;;  %v5435_v39 = vrot.slane %v3771_v51, 7  ;;  %v4262_v55 = vmul.f32 %v3671_v30, %v4191_v29  ;;  %v2267_v31 = vmax.f32 %v2235_v20, 0.0 }
 0x170   : > { %5433 = vst [vmem:[#allocation87_spill] sm:$0xff] %v4238_v43  ;;  %v4258_v47 = vadd.f32 %v1280_v32, %v1211_v36  ;;  %v4271_v63 = vmul.f32 %v3660_v22, %v4235_v58  ;;  %v2268_v35 = vmax.f32 %v2236_v54, 0.0  ;;  %v1108_v36 = vrot.slane %v3771_v51, 1 }
 0x171   : > { %v4256_v34 = vsel %vm1071_vm1, %v5435_v39, %v5434_v24  ;;  %5437 = vst [vmem:[#allocation89_spill] sm:$0xff] %v4262_v55  ;;  %v5438_v26 = vmov %v5435_v39  ;;  %v5322_v24 = vrot.slane %v4246_v38, 7  ;;  %v2299_v32 = vmin.f32 %v2267_v31, 6.0 }
 0x172   : > { %5436 = vst [vmem:[#allocation88_spill] sm:$0xff] %v4258_v47  ;;  %v1092_v33 = vsel %vm1071_vm1, %v3623_v1, %v5438_v26  ;;  %5439 = vst [vmem:[#allocation90_spill] sm:$0xff] %v4271_v63  ;;  %v823_v16 = vmax.f32 %v753_v61, 0.0  ;;  %v1124_v20 = vrot.slane %v3858_v21, 1  ;;  %v2300_v10 = vmin.f32 %v2268_v35, 6.0  ;;  %v5449_v47 = vld [vmem:[#allocation24_spill] sm:$0xff] }
 0x173   : > { %v4282_v26 = vsel %vm1071_vm1, %v3623_v1, %v5322_v24  ;;  %v1198_v54 = vmul.f32 %v3628_v2, %v1092_v33  ;;  %v1199_v55 = vmul.f32 %v3628_v2, %v4256_v34  ;;  %v1285_v61 = vmul.f32 %v3633_v3, %v4246_v38 }
 0x174   : > { %5440 = vst [vmem:[#allocation91_spill] sm:$0xff] %v4282_v26  ;;  %v1216_v31 = vmul.f32 %v3628_v2, %v4282_v26  ;;  %v4291_v39 = vmin.f32 %v823_v16, 6.0  ;;  %v4296_v35 = vsel %vm1152_vm2, %v1124_v20, %v3640_v7  ;;  %v2330_v24 = vpack.c.bf16 %v2300_v10, %v2299_v32 }
 0x175   : > { %v4300_v19 = vmul.f32 %v3671_v30, %v4246_v38  ;;  %v1173_v43 = vsel %vm1152_vm2, %v1108_v36, %v1124_v20  ;;  %v1300_v46 = vadd.f32 %v3886_v60, %v1199_v55  ;;  %v4309_v16 = vmul.f32 %v3660_v22, %v4282_v26 }
 0x176   : > { %v4305_v63 = vadd.f32 %v1285_v61, %v1216_v31  ;;  %v5325_v17 = vrot.slane %v4291_v39, 7  ;;  %v1299_v23 = vadd.f32 %v3842_v53, %v1198_v54  ;;  %2970 = vmatmul.mubr.bf16.vlgmr.msra.gmra.mxu0 %v2330_v24  ;;  %v1336_v32 = vmul.f32 %v3649_v11, %v1173_v43 }
 0x177   : > { %5441 = vst [vmem:[#allocation92_spill] sm:$0xff] %v4300_v19  ;;  %5443 = vst [vmem:[#allocation94_spill] sm:$0xff] %v4309_v16  ;;  %v1337_v36 = vmul.f32 %v3649_v11, %v4296_v35  ;;  %v1364_v60 = vadd.f32 %v4098_v41, %v3767_v49  ;;  %v1283_v53 = vmul.f32 %v3633_v3, %v4291_v39  ;;  %v5445_v19 = vld [vmem:[#allocation25_spill] sm:$0xff] }
 0x178   : > { %5442 = vst [vmem:[#allocation93_spill] sm:$0xff] %v4305_v63  ;;  %v4324_v55 = vsel %vm1071_vm1, %v3623_v1, %v5325_v17  ;;  %v4330_v24 = vmul.f32 %v3671_v30, %v4291_v39  ;;  %v1365_v20 = vadd.f32 %v4101_v50, %v3846_v6  ;;  %v1366_v49 = vadd.f32 %v3802_v25, %v3765_v48  ;;  %v5446_v48 = vld [vmem:[#allocation29_spill] sm:$0xff] }
 0x179   : > { %v1368_v41 = vadd.f32 %v1336_v32, %v1299_v23  ;;  %v1369_v54 = vadd.f32 %v1337_v36, %v1300_v46  ;;  %v1611_v31 = vmul.f32 %v3660_v22, %v3718_v8  ;;  %v1612_v61 = vmul.f32 %v3660_v22, %v3784_v13  ;;  %v5447_v46 = vld [vmem:[#allocation27_spill] sm:$0xff] }
 0x17a   : > { %5444 = vst [vmem:[#allocation95_spill] sm:$0xff] %v4330_v24  ;;  %v1613_v10 = vmul.f32 %v3660_v22, %v1092_v33  ;;  %v1614_v17 = vmul.f32 %v3660_v22, %v4256_v34  ;;  %v1615_v16 = vmul.f32 %v3660_v22, %v5445_v19  ;;  %v1214_v6 = vmul.f32 %v3628_v2, %v4324_v55  ;;  %v5448_v24 = vld [vmem:[#allocation21_spill] sm:$0xff] }
 0x17b   : > { %v1616_v25 = vmul.f32 %v3660_v22, %v5446_v48  ;;  %v1643_v50 = vadd.f32 %v1611_v31, %v1364_v60  ;;  %v1749_v8 = vmul.f32 %v3681_v44, %v3793_v18  ;;  %v1644_v23 = vadd.f32 %v1612_v61, %v1365_v20  ;;  %v5450_v31 = vld [vmem:[#allocation28_spill] sm:$0xff] }
 0x17c   : > { %v1645_v13 = vadd.f32 %v1613_v10, %v1366_v49  ;;  %v1646_v32 = vadd.f32 %v1614_v17, %v5447_v46  ;;  %v4352_v36 = vadd.f32 %v1615_v16, %v1368_v41  ;;  %v1750_v58 = vmul.f32 %v3681_v44, %v3789_v15  ;;  %v5451_v18 = vld [vmem:[#allocation36_spill] sm:$0xff] }
 0x17d   : > { %v4354_v26 = vadd.f32 %v1616_v25, %v1369_v54  ;;  %v1712_v63 = vadd.f32 %v5448_v24, %v1643_v50  ;;  %v1751_v14 = vmul.f32 %v3681_v44, %v1173_v43  ;;  %v1713_v60 = vadd.f32 %v5449_v47, %v1644_v23 }
 0x17e   : > { %v1714_v57 = vadd.f32 %v5450_v31, %v1645_v13  ;;  %v1715_v20 = vadd.f32 %v5451_v18, %v1646_v32  ;;  %v1752_v17 = vmul.f32 %v3681_v44, %v4296_v35  ;;  %v4367_v16 = vmul.f32 %v3660_v22, %v4324_v55 }
 0x17f   : > { %v1781_v10 = vadd.f32 %v1749_v8, %v1712_v63  ;;  %v2028_v24 = vmul.f32 %v3713_v5, %v1092_v33  ;;  %v2029_v15 = vmul.f32 %v3713_v5, %v4256_v34  ;;  %v1782_v49 = vadd.f32 %v1750_v58, %v1713_v60  ;;  %v5452_v58 = vld [vmem:[#allocation23_spill] sm:$0xff]  ;;  %v5455_v34 = vld [vmem:[#allocation22_spill] sm:$0xff] }
 0x180   : > { %v1783_v41 = vadd.f32 %v1751_v14, %v1714_v57  ;;  %v1784_v47 = vadd.f32 %v1752_v17, %v1715_v20  ;;  %v2097_v54 = vmul.f32 %v3706_v59, %v3771_v51  ;;  %v2098_v25 = vmul.f32 %v3706_v59, %v3858_v21  ;;  %v5457_v17 = vld [vmem:[#allocation30_spill] sm:$0xff] }
 0x181   : > { %v2060_v61 = vadd.f32 %v2028_v24, %v1781_v10  ;;  %v2166_v50 = vmul.f32 %v4146_v37, %v1173_v43  ;;  %v764_v63 = vadd.f32 %v4004_v9, %v3638_v4  ;;  %v2061_v8 = vadd.f32 %v2029_v15, %v1782_v49  ;;  %v5458_v24 = vld [vmem:[#allocation32_spill] sm:$0xff] }
 0x182   : > { %v756_v33 = vadd.f32 %v3638_v4, %v4025_v62  ;;  %v5453_v14 = vrot.slane %v5452_v58, 1  ;;  %v5456_v23 = vrot.slane %v5455_v34, 1  ;;  %v4394_v62 = vadd.f32 %v1283_v53, %v1214_v6 }
 0x183   : > { %v2129_v43 = vadd.f32 %v2097_v54, %v2060_v61  ;;  %v826_v13 = vmax.f32 %v764_v63, 0.0  ;;  %v2130_v32 = vadd.f32 %v2098_v25, %v2061_v8  ;;  %v2167_v60 = vmul.f32 %v4146_v37, %v4296_v35 }
 0x184   : > { %v1158_v57 = vsel %vm1152_vm2, %v5453_v14, %v3640_v7  ;;  %v5454_v51 = vmov %v5453_v14  ;;  %v824_v31 = vmax.f32 %v756_v33, 0.0  ;;  %v2030_v25 = vmul.f32 %v3713_v5, %v5445_v19 }
 0x185   : > { %v1174_v21 = vsel %vm1152_vm2, %v5456_v23, %v5454_v51  ;;  %v1339_v46 = vmul.f32 %v3649_v11, %v1158_v57  ;;  %v2198_v18 = vadd.f32 %v2166_v50, %v2129_v43  ;;  %v4398_v20 = vmin.f32 %v826_v13, 6.0 }
 0x186   : > { %v1338_v9 = vmul.f32 %v3649_v11, %v1174_v21  ;;  %v2199_v49 = vadd.f32 %v2167_v60, %v2130_v32  ;;  %v4406_v54 = vmin.f32 %v824_v31, 6.0  ;;  %v1753_v53 = vmul.f32 %v3681_v44, %v1174_v21 }
 0x187   : > { %v4404_v15 = vadd.f32 %v1339_v46, %v5458_v24  ;;  %v4410_v6 = vmul.f32 %v3681_v44, %v1158_v57  ;;  %v2237_v35 = vadd.f32 %v4161_v52, %v2198_v18  ;;  %v1050_v61 = vrot.slane %v4398_v20, 7 }
 0x188   : > { %v4401_v10 = vadd.f32 %v1338_v9, %v5457_v17  ;;  %v2031_v50 = vmul.f32 %v3713_v5, %v5446_v48  ;;  %v2238_v63 = vadd.f32 %v4161_v52, %v2199_v49  ;;  %v1286_v33 = vmul.f32 %v3633_v3, %v4398_v20 }
 0x189   : > { %v1049_v14 = vrot.slane %v4406_v54, 7  ;;  %v2269_v51 = vmax.f32 %v2237_v35, 0.0  ;;  %v5459_v23 = vrot.slane %v4246_v38, 7  ;;  %v4431_v19 = vmul.f32 %v3671_v30, %v4398_v20 }
 0x18a   : > { %v2270_v13 = vmax.f32 %v2238_v63, 0.0  ;;  %v5462_v46 = vrot.slane %v4291_v39, 7  ;;  %v1284_v60 = vmul.f32 %v3633_v3, %v4406_v54  ;;  %v4448_v17 = vmul.f32 %v3671_v30, %v4406_v54 }
 0x18b   : > { %v4427_v43 = vsel %vm1071_vm1, %v5459_v23, %v1050_v61  ;;  %5461 = vst [vmem:[#allocation29_spill] sm:$0xff] %v4431_v19  ;;  %v2301_v31 = vmin.f32 %v2269_v51, 6.0  ;;  %v2062_v24 = vadd.f32 %v2030_v25, %v1783_v41  ;;  %v2063_v61 = vadd.f32 %v2031_v50, %v1784_v47  ;;  %v5463_v41 = vld [vmem:[#allocation64_spill] sm:$0xff] }
 0x18c   : > { %5460 = vst [vmem:[#allocation25_spill] sm:$0xff] %v4427_v43  ;;  %v1217_v9 = vmul.f32 %v3628_v2, %v4427_v43  ;;  %v4440_v32 = vsel %vm1071_vm1, %v5462_v46, %v1049_v14  ;;  %v2302_v49 = vmin.f32 %v2270_v13, 6.0  ;;  %v2099_v63 = vmul.f32 %v3706_v59, %v5455_v34  ;;  %v5464_v34 = vld [vmem:[#allocation43_spill] sm:$0xff]  ;;  %v5495_v19 = vld [vmem:[#allocation52_spill] sm:$0xff] }
 0x18d   : > { %v1215_v18 = vmul.f32 %v3628_v2, %v4440_v32  ;;  %v2100_v51 = vmul.f32 %v3706_v59, %v5452_v58  ;;  %v2168_v23 = vmul.f32 %v4146_v37, %v1174_v21  ;;  %v2169_v2 = vmul.f32 %v4146_v37, %v1158_v57  ;;  %v5467_v21 = vld [vmem:[#allocation34_spill] sm:$0xff] }
 0x18e   : > { %v4450_v35 = vadd.f32 %v1286_v33, %v1217_v9  ;;  %v2331_v46 = vpack.c.bf16 %v2302_v49, %v2301_v31  ;;  %v2131_v8 = vadd.f32 %v2099_v63, %v2062_v24  ;;  %v777_v25 = vadd.f32 %v5463_v41, %v3638_v4 }
 0x18f   : > { %v4454_v14 = vadd.f32 %v1284_v60, %v1215_v18  ;;  %v769_v47 = vadd.f32 %v3638_v4, %v4079_v0  ;;  %v2132_v50 = vadd.f32 %v2100_v51, %v2063_v61  ;;  %v5465_v33 = vrot.slane %v5464_v34, 1  ;;  %v5469_v60 = vld [vmem:[#allocation26_spill] sm:$0xff]  ;;  %v5471_v51 = vld [vmem:[#allocation31_spill] sm:$0xff] }
 0x190   : > { %v5468_v9 = vrot.slane %v5467_v21, 1  ;;  %v1716_v31 = vadd.f32 %v5469_v60, %v4352_v36  ;;  %2973 = vmatprep.mubr.bf16.mxu1 %v2331_v46  ;;  %v2200_v18 = vadd.f32 %v2168_v23, %v2131_v8  ;;  %v829_v4 = vmax.f32 %v777_v25, 0.0  ;;  %v5474_v8 = vld [vmem:[#allocation48_spill] sm:$0xff]  ;;  %v5475_v25 = vld [vmem:[#allocation58_spill] sm:$0xff] }
 0x191   : > { %v1159_v13 = vsel %vm1152_vm2, %v5465_v33, %v3640_v7  ;;  %v5466_v58 = vmov %v5465_v33  ;;  %v827_v0 = vmax.f32 %v769_v47, 0.0  ;;  %v4480_v49 = vmul.f32 %v3660_v22, %v4427_v43 }
 0x192   : > { %v1175_v57 = vsel %vm1152_vm2, %v5468_v9, %v5466_v58  ;;  %v2201_v61 = vadd.f32 %v2169_v2, %v2132_v50  ;;  %v1341_v63 = vmul.f32 %v3649_v11, %v1159_v13  ;;  %v1717_v41 = vadd.f32 %v5471_v51, %v4354_v26 }
 0x193   : > { %v1340_v24 = vmul.f32 %v3649_v11, %v1175_v57  ;;  %5470 = vst [vmem:[#allocation27_spill] sm:$0xff] %v4480_v49  ;;  %v2239_v33 = vadd.f32 %v4161_v52, %v2200_v18  ;;  %v4486_v58 = vmin.f32 %v829_v4, 6.0  ;;  %v4488_v36 = vmin.f32 %v827_v0, 6.0  ;;  %v5483_v4 = vld [vmem:[#allocation51_spill] sm:$0xff] }
 0x194   : > { %v4495_v46 = vmul.f32 %v3660_v22, %v4440_v32  ;;  %v2240_v2 = vadd.f32 %v4161_v52, %v2201_v61  ;;  %v4499_v11 = vadd.f32 %v1341_v63, %v5475_v25  ;;  %v1785_v47 = vadd.f32 %v1753_v53, %v1716_v31  ;;  %v5481_v31 = vld [vmem:[#allocation40_spill] sm:$0xff] }
 0x195   : > { %5472 = vst [vmem:[#allocation21_spill] sm:$0xff] %v4486_v58  ;;  %5473 = vst [vmem:[#allocation24_spill] sm:$0xff] %v4488_v36  ;;  %v4491_v23 = vadd.f32 %v1340_v24, %v5474_v8  ;;  %v2271_v26 = vmax.f32 %v2239_v33, 0.0  ;;  %v5330_v50 = vrot.slane %v4486_v58, 7  ;;  %v4503_v9 = vmul.f32 %v3681_v44, %v1175_v57 }
 0x196   : > { %v4506_v60 = vmul.f32 %v3681_v44, %v1159_v13  ;;  %v2272_v18 = vmax.f32 %v2240_v2, 0.0  ;;  %v1289_v0 = vmul.f32 %v3633_v3, %v4486_v58  ;;  %v5329_v24 = vrot.slane %v4488_v36, 7  ;;  %v3104_v2 = vld [vmem:[%s5271_s5] ss:$0 sm:$0xff] }
 0x197   : > { %v2303_v61 = vmin.f32 %v2271_v26, 6.0  ;;  %v4517_v53 = vsel %vm1071_vm1, %v3623_v1, %v5330_v50  ;;  %v4521_v44 = vmul.f32 %v3671_v30, %v4486_v58  ;;  %v1287_v33 = vmul.f32 %v3633_v3, %v4488_v36 }
 0x198   : > { %5476 = vst [vmem:[#allocation28_spill] sm:$0xff] %v4517_v53  ;;  %v2304_v63 = vmin.f32 %v2272_v18, 6.0  ;;  %v4529_v51 = vsel %vm1071_vm1, %v3623_v1, %v5329_v24  ;;  %v4535_v8 = vmul.f32 %v3671_v30, %v4488_v36  ;;  %v1220_v25 = vmul.f32 %v3104_v2, %v4517_v53 }
 0x199   : > { %5477 = vst [vmem:[#allocation36_spill] sm:$0xff] %v4521_v44  ;;  %5478 = vst [vmem:[#allocation23_spill] sm:$0xff] %v4529_v51  ;;  %v4543_v26 = vmul.f32 %v3660_v22, %v4517_v53  ;;  %v1786_v18 = vadd.f32 %v4410_v6, %v1717_v41  ;;  %v2032_v48 = vmul.f32 %v3713_v5, %v5481_v31  ;;  %v5490_v53 = vld [vmem:[#allocation56_spill] sm:$0xff] }
 0x19a   : > { %5479 = vst [vmem:[#allocation22_spill] sm:$0xff] %v4535_v8  ;;  %v2332_v3 = vpack.c.bf16 %v2304_v63, %v2303_v61  ;;  %v1218_v24 = vmul.f32 %v3104_v2, %v4529_v51  ;;  %v4551_v30 = vmul.f32 %v3660_v22, %v4529_v51  ;;  %v2033_v50 = vmul.f32 %v3713_v5, %v5483_v4  ;;  %v4564_v22 = vld [vmem:[%s5270_s4] ss:$0 sm:$0xff] }
 0x19b   : > { %5480 = vst [vmem:[#allocation30_spill] sm:$0xff] %v4543_v26  ;;  %v2064_v44 = vadd.f32 %v2032_v48, %v1785_v47  ;;  %v2101_v8 = vmul.f32 %v3706_v59, %v5467_v21  ;;  %v2102_v6 = vmul.f32 %v3706_v59, %v5464_v34  ;;  %v2170_v41 = vmul.f32 %v4146_v37, %v1175_v57  ;;  %v5484_v59 = vld [vmem:[#allocation35_spill] sm:$0xff]  ;;  %v5487_v47 = vld [vmem:[#allocation33_spill] sm:$0xff] }
 0x19c   : > { %5482 = vst [vmem:[#allocation32_spill] sm:$0xff] %v4551_v30  ;;  %2974 = vmatmul.mubr.bf16.vlgmr.msra.gmra.mxu1 %v2332_v3  ;;  %v2065_v61 = vadd.f32 %v2033_v50, %v1786_v18  ;;  %v2171_v31 = vmul.f32 %v4146_v37, %v1159_v13  ;;  %v780_v5 = vadd.f32 %v4564_v22, %v4093_v27  ;;  %v5485_v34 = vrot.slane %v5484_v59, 1  ;;  %v5489_v27 = vld [vmem:[#allocation44_spill] sm:$0xff] }
 0x19d   : > { %v772_v48 = vadd.f32 %v4564_v22, %v4109_v28  ;;  %v2133_v21 = vadd.f32 %v2101_v8, %v2064_v44  ;;  %v5488_v50 = vrot.slane %v5487_v47, 1  ;;  %v1649_v63 = vadd.f32 %v5489_v27, %v4401_v10  ;;  %v4588_v8 = vld [vmem:[%s5271_s5 + $0x2] ss:$0 sm:$0xff] }
 0x19e   : > { %v4575_v57 = vsel %vm1152_vm2, %v5485_v34, %v3640_v7  ;;  %v5486_v13 = vmov %v5485_v34  ;;  %v2134_v18 = vadd.f32 %v2102_v6, %v2065_v61  ;;  %v830_v28 = vmax.f32 %v780_v5, 0.0  ;;  %v5493_v5 = vld [vmem:[#allocation47_spill] sm:$0xff] }
 0x19f   : > { %v1176_v4 = vsel %vm1152_vm2, %v5488_v50, %v5486_v13  ;;  %v828_v44 = vmax.f32 %v772_v48, 0.0  ;;  %v2202_v34 = vadd.f32 %v2170_v41, %v2133_v21  ;;  %v1343_v26 = vmul.f32 %v4588_v8, %v4575_v57  ;;  %v5491_v50 = vld [vmem:[#allocation39_spill] sm:$0xff]  ;;  %v5494_v41 = vld [vmem:[#allocation50_spill] sm:$0xff] }
 0x1a0   : > { %v1342_v3 = vmul.f32 %v4588_v8, %v1176_v4  ;;  %v1650_v13 = vadd.f32 %v5490_v53, %v4404_v15  ;;  %v1718_v30 = vadd.f32 %v5491_v50, %v1649_v63  ;;  %v2203_v10 = vadd.f32 %v2171_v31, %v2134_v18  ;;  %v5601_v12 = vld [vmem:[#allocation36_spill] sm:$0xff] }
 0x1a1   : > { %v4596_v6 = vmin.f32 %v830_v28, 6.0  ;;  %v4598_v61 = vmin.f32 %v828_v44, 6.0  ;;  %v1321_v27 = vadd.f32 %v1289_v0, %v1220_v25  ;;  %v2241_v51 = vadd.f32 %v4161_v52, %v2202_v34  ;;  %v3107_v0 = vld [vmem:[%s5271_s5 + $0x1] ss:$0 sm:$0xff] }
 0x1a2   : > { %v4601_v48 = vadd.f32 %v1342_v3, %v5493_v5  ;;  %v4605_v21 = vadd.f32 %v1343_v26, %v5494_v41  ;;  %v1719_v49 = vadd.f32 %v5495_v19, %v1650_v13  ;;  %v4608_v43 = vadd.f32 %v1287_v33, %v1218_v24  ;;  %v4621_v19 = vld [vmem:[%s5271_s5 + $0x6] ss:$0 sm:$0xff]  ;;  %v4639_v3 = vld [vmem:[%s5271_s5 + $0x5] ss:$0 sm:$0xff]  ;;  %v5508_v41 = vld [vmem:[#allocation42_spill] sm:$0xff] }
 0x1a3   : > { %5492 = vst [vmem:[#allocation64_spill] sm:$0xff] %v4596_v6  ;;  %v2242_v15 = vadd.f32 %v4161_v52, %v2203_v10  ;;  %v1052_v53 = vrot.slane %v4596_v6, 7  ;;  %v1135_v31 = vrot.slane %v4596_v6, 1  ;;  %v2273_v63 = vmax.f32 %v2241_v51, 0.0 }
 0x1a4   : > { %5496 = vst [vmem:[#allocation43_spill] sm:$0xff] %v4608_v43  ;;  %v1290_v25 = vmul.f32 %v3107_v0, %v4596_v6  ;;  %v1051_v26 = vrot.slane %v4598_v61, 7  ;;  %v1757_v24 = vmul.f32 %v4621_v19, %v1176_v4  ;;  %v5497_v18 = vrot.slane %v4486_v58, 7  ;;  %v5515_v43 = vld [vmem:[#allocation37_spill] sm:$0xff] }
 0x1a5   : > { %v2274_v33 = vmax.f32 %v2242_v15, 0.0  ;;  %v5499_v28 = vrot.slane %v4486_v58, 1  ;;  %v4643_v34 = vmul.f32 %v4639_v3, %v4596_v6  ;;  %v4648_v13 = vsel %vm1152_vm2, %v1135_v31, %v3640_v7 }
 0x1a6   : > { %v4628_v51 = vsel %vm1071_vm1, %v5497_v18, %v1052_v53  ;;  %v5502_v10 = vrot.slane %v4488_v36, 7  ;;  %v2305_v15 = vmin.f32 %v2273_v63, 6.0  ;;  %v1787_v63 = vadd.f32 %v4503_v9, %v1718_v30  ;;  %v4691_v9 = vld [vmem:[%s5271_s5 + $0x9] ss:$0 sm:$0xff] }
 0x1a7   : > { %5498 = vst [vmem:[#allocation34_spill] sm:$0xff] %v4628_v51  ;;  %v4634_v44 = vsel %vm1152_vm2, %v5499_v28, %v1135_v31  ;;  %5501 = vst [vmem:[#allocation31_spill] sm:$0xff] %v4643_v34  ;;  %v1221_v50 = vmul.f32 %v3104_v2, %v4628_v51  ;;  %v2306_v53 = vmin.f32 %v2274_v33, 6.0  ;;  %v1288_v28 = vmul.f32 %v3107_v0, %v4598_v61  ;;  %v4665_v31 = vld [vmem:[%s5271_s5 + $0x4] ss:$0 sm:$0xff] }
 0x1a8   : > { %5500 = vst [vmem:[#allocation26_spill] sm:$0xff] %v4634_v44  ;;  %v4655_v5 = vsel %vm1071_vm1, %v5502_v10, %v1051_v26  ;;  %v4669_v6 = vmul.f32 %v4665_v31, %v4628_v51  ;;  %v1788_v0 = vadd.f32 %v4506_v60, %v1719_v49  ;;  %v2103_v30 = vmul.f32 %v4691_v9, %v5487_v47 }
 0x1a9   : > { %5503 = vst [vmem:[#allocation48_spill] sm:$0xff] %v4655_v5  ;;  %v1219_v18 = vmul.f32 %v3104_v2, %v4655_v5  ;;  %v4660_v34 = vadd.f32 %v1290_v25, %v1221_v50  ;;  %v4673_v26 = vmul.f32 %v4665_v31, %v4655_v5  ;;  %v2333_v2 = vpack.c.bf16 %v2306_v53, %v2305_v15  ;;  %v4682_v25 = vld [vmem:[%s5271_s5 + $0x8] ss:$0 sm:$0xff]  ;;  %v5507_v50 = vld [vmem:[#allocation38_spill] sm:$0xff] }
 0x1aa   : > { %5504 = vst [vmem:[#allocation58_spill] sm:$0xff] %v4669_v6  ;;  %v2034_v10 = vmul.f32 %v4682_v25, %v5507_v50  ;;  %v2035_v6 = vmul.f32 %v4682_v25, %v5508_v41  ;;  %v2104_v49 = vmul.f32 %v4691_v9, %v5484_v59  ;;  %v2172_v60 = vmul.f32 %v4146_v37, %v1176_v4 }
 0x1ab   : > { %5505 = vst [vmem:[#allocation40_spill] sm:$0xff] %v4673_v26  ;;  %v4676_v33 = vadd.f32 %v1288_v28, %v1219_v18  ;;  %2977 = vmatprep.mubr.bf16.mxu1 %v2333_v2  ;;  %v2173_v53 = vmul.f32 %v4146_v37, %v4575_v57  ;;  %v785_v41 = vadd.f32 %v4564_v22, %v4148_v56  ;;  %v5509_v47 = vrot.slane %v4085_v42, 1  ;;  %v5511_v2 = vld [vmem:[#allocation53_spill] sm:$0xff] }
 0x1ac   : > { %v2066_v15 = vadd.f32 %v2034_v10, %v1787_v63  ;;  %v1358_v18 = vmul.f32 %v4588_v8, %v4634_v44  ;;  %v2067_v28 = vadd.f32 %v2035_v6, %v1788_v0  ;;  %v5512_v63 = vrot.slane %v5511_v2, 1  ;;  %v5513_v10 = vld [vmem:[#allocation41_spill] sm:$0xff] }
 0x1ad   : > { %5506 = vst [vmem:[#allocation51_spill] sm:$0xff] %v4676_v33  ;;  %v1161_v59 = vsel %vm1152_vm2, %v5509_v47, %v3640_v7  ;;  %v5510_v4 = vmov %v5509_v47  ;;  %v1651_v56 = vadd.f32 %v5513_v10, %v4491_v23  ;;  %v831_v51 = vmax.f32 %v785_v41, 0.0  ;;  %v5514_v47 = vld [vmem:[#allocation49_spill] sm:$0xff] }
 0x1ae   : > { %v1177_v50 = vsel %vm1152_vm2, %v5512_v63, %v5510_v4  ;;  %v2135_v58 = vadd.f32 %v2103_v30, %v2066_v15  ;;  %v1390_v44 = vadd.f32 %v1358_v18, %v1321_v27  ;;  %v2136_v0 = vadd.f32 %v2104_v49, %v2067_v28  ;;  %v5516_v49 = vld [vmem:[#allocation73_spill] sm:$0xff] }
 0x1af   : > { %v1344_v6 = vmul.f32 %v4588_v8, %v1177_v50  ;;  %v1345_v26 = vmul.f32 %v4588_v8, %v1161_v59  ;;  %v1652_v5 = vadd.f32 %v5514_v47, %v4499_v11  ;;  %v1720_v33 = vadd.f32 %v5515_v43, %v1651_v56  ;;  %v5517_v11 = vld [vmem:[#allocation45_spill] sm:$0xff]  ;;  %v5520_v56 = vld [vmem:[#allocation70_spill] sm:$0xff] }
 0x1b0   : > { %v4724_v36 = vmul.f32 %v4639_v3, %v4598_v61  ;;  %v2204_v4 = vadd.f32 %v2172_v60, %v2135_v58  ;;  %v4726_v63 = vmin.f32 %v831_v51, 6.0  ;;  %v1758_v27 = vmul.f32 %v4621_v19, %v4575_v57 }
 0x1b1   : > { %v4729_v23 = vadd.f32 %v1344_v6, %v4081_v45  ;;  %v2205_v30 = vadd.f32 %v2173_v53, %v2136_v0  ;;  %v4734_v15 = vadd.f32 %v1345_v26, %v5516_v49  ;;  %v1721_v41 = vadd.f32 %v5517_v11, %v1652_v5  ;;  %v5519_v5 = vld [vmem:[#allocation61_spill] sm:$0xff]  ;;  %v787_v0 = vpop.f32.mrf.mxu0 }
 0x1b2   : > { %v2243_v43 = vadd.f32 %v4161_v52, %v2204_v4  ;;  %v1456_v18 = vrot.slane %v4726_v63, 7  ;;  %v1759_v58 = vmul.f32 %v4621_v19, %v1177_v50  ;;  %v1760_v51 = vmul.f32 %v4621_v19, %v1161_v59 }
 0x1b3   : > { %v2244_v45 = vadd.f32 %v4161_v52, %v2205_v30  ;;  %v1789_v28 = vadd.f32 %v1757_v24, %v1720_v33  ;;  %v1790_v57 = vadd.f32 %v1758_v27, %v1721_v41  ;;  %v2036_v10 = vmul.f32 %v4682_v25, %v5519_v5 }
 0x1b4   : > { %v2275_v53 = vmax.f32 %v2243_v43, 0.0  ;;  %v4746_v26 = vsel %vm1071_vm1, %v3623_v1, %v1456_v18  ;;  %v2037_v6 = vmul.f32 %v4682_v25, %v5520_v56  ;;  %v1706_v24 = vmul.f32 %v4639_v3, %v4726_v63 }
 0x1b5   : > { %5518 = vst [vmem:[#allocation35_spill] sm:$0xff] %v4746_v26  ;;  %v2276_v47 = vmax.f32 %v2244_v45, 0.0  ;;  %v1637_v4 = vmul.f32 %v4665_v31, %v4746_v26  ;;  %v2105_v33 = vmul.f32 %v4691_v9, %v5511_v2  ;;  %v2068_v30 = vadd.f32 %v2036_v10, %v1789_v28  ;;  %v5521_v28 = vld [vmem:[#allocation55_spill] sm:$0xff] }
 0x1b6   : > { %v2307_v27 = vmin.f32 %v2275_v53, 6.0  ;;  %v2069_v49 = vadd.f32 %v2037_v6, %v1790_v57  ;;  %v2106_v11 = vmul.f32 %v4691_v9, %v4085_v42  ;;  %v2174_v5 = vmul.f32 %v4146_v37, %v1177_v50  ;;  %v5524_v50 = vld [vmem:[#allocation46_spill] sm:$0xff] }
 0x1b7   : > { %v2308_v41 = vmin.f32 %v2276_v47, 6.0  ;;  %v1669_v43 = vadd.f32 %v1637_v4, %v1390_v44  ;;  %v788_v45 = vadd.f32 %v4564_v22, %v787_v0  ;;  %v2137_v56 = vadd.f32 %v2105_v33, %v2068_v30 }
 0x1b8   : > { %v2138_v60 = vadd.f32 %v2106_v11, %v2069_v49  ;;  %v2175_v1 = vmul.f32 %v4146_v37, %v1161_v59  ;;  %v1359_v26 = vmul.f32 %v4588_v8, %v4648_v13  ;;  %v5522_v57 = vrot.slane %v5521_v28, 1  ;;  %v5528_v49 = vld [vmem:[#allocation72_spill] sm:$0xff] }
 0x1b9   : > { %v2334_v2 = vpack.c.bf16 %v2308_v41, %v2307_v27  ;;  %v832_v53 = vmax.f32 %v788_v45, 0.0  ;;  %v5525_v10 = vrot.slane %v5524_v50, 1  ;;  %v2206_v6 = vadd.f32 %v2174_v5, %v2137_v56  ;;  %v5527_v27 = vld [vmem:[#allocation65_spill] sm:$0xff] }
 0x1ba   : > { %v1162_v42 = vsel %vm1152_vm2, %v5522_v57, %v3640_v7  ;;  %v5523_v44 = vmov %v5522_v57  ;;  %v2207_v59 = vadd.f32 %v2175_v1, %v2138_v60  ;;  %v1391_v0 = vadd.f32 %v1359_v26, %v4660_v34  ;;  %v5529_v60 = vld [vmem:[#allocation60_spill] sm:$0xff] }
 0x1bb   : > { %v1178_v22 = vsel %vm1152_vm2, %v5525_v10, %v5523_v44  ;;  %2978 = vmatmul.mubr.bf16.gmra.mxu1 %v2334_v2  ;;  %v4780_v4 = vmul.f32 %v4691_v9, %v4726_v63  ;;  %v4782_v33 = vmin.f32 %v832_v53, 6.0  ;;  %v1653_v30 = vadd.f32 %v5527_v27, %v4601_v48  ;;  %v5532_v44 = vld [vmem:[#allocation62_spill] sm:$0xff] }
 0x1bc   : > { %v1346_v47 = vmul.f32 %v4588_v8, %v1178_v22  ;;  %v1654_v11 = vadd.f32 %v5528_v49, %v4605_v21  ;;  %v2245_v41 = vadd.f32 %v4161_v52, %v2206_v6  ;;  %v2246_v1 = vadd.f32 %v4161_v52, %v2207_v59  ;;  %v5531_v21 = vld [vmem:[#allocation68_spill] sm:$0xff] }
 0x1bd   : > { %5526 = vst [vmem:[#allocation33_spill] sm:$0xff] %v4780_v4  ;;  %v1347_v34 = vmul.f32 %v4588_v8, %v1162_v42  ;;  %v4794_v5 = vadd.f32 %v1706_v24, %v1669_v43  ;;  %v1472_v45 = vrot.slane %v4782_v33, 7  ;;  %v1761_v48 = vmul.f32 %v4621_v19, %v1178_v22  ;;  %v5535_v43 = vld [vmem:[#allocation71_spill] sm:$0xff] }
 0x1be   : > { %v4792_v26 = vadd.f32 %v1346_v47, %v5529_v60  ;;  %v2277_v2 = vmax.f32 %v2245_v41, 0.0  ;;  %v2278_v53 = vmax.f32 %v2246_v1, 0.0  ;;  %v1722_v10 = vadd.f32 %v5532_v44, %v1653_v30  ;;  %v5536_v47 = vld [vmem:[#allocation54_spill] sm:$0xff] }
 0x1bf   : > { %5530 = vst [vmem:[#allocation44_spill] sm:$0xff] %v4794_v5  ;;  %v1379_v57 = vadd.f32 %v1347_v34, %v5531_v21  ;;  %v4803_v6 = vsel %vm1071_vm1, %v1456_v18, %v1472_v45  ;;  %v4807_v24 = vmul.f32 %v4639_v3, %v4782_v33  ;;  %v1723_v59 = vadd.f32 %v5535_v43, %v1654_v11  ;;  %v5537_v18 = vld [vmem:[#allocation63_spill] sm:$0xff]  ;;  %v5556_v5 = vld [vmem:[#allocation78_spill] sm:$0xff] }
 0x1c0   : > { %5533 = vst [vmem:[#allocation56_spill] sm:$0xff] %v4803_v6  ;;  %v2038_v27 = vmul.f32 %v4682_v25, %v5536_v47  ;;  %v2309_v49 = vmin.f32 %v2277_v2, 6.0  ;;  %v2310_v41 = vmin.f32 %v2278_v53, 6.0  ;;  %v1638_v1 = vmul.f32 %v4665_v31, %v4803_v6 }
 0x1c1   : > { %5534 = vst [vmem:[#allocation39_spill] sm:$0xff] %v4807_v24  ;;  %v1791_v34 = vadd.f32 %v1759_v58, %v1722_v10  ;;  %v1762_v30 = vmul.f32 %v4621_v19, %v1162_v42  ;;  %v1792_v60 = vadd.f32 %v1760_v51, %v1723_v59  ;;  %v2039_v45 = vmul.f32 %v4682_v25, %v5537_v18  ;;  %v5543_v18 = vld [vmem:[#allocation84_spill] sm:$0xff] }
 0x1c2   : > { %v2107_v3 = vmul.f32 %v4691_v9, %v5524_v50  ;;  %v2335_v21 = vpack.c.bf16 %v2310_v41, %v2309_v49  ;;  %v4819_v11 = vadd.f32 %v1638_v1, %v1391_v0  ;;  %v2108_v2 = vmul.f32 %v4691_v9, %v5521_v28  ;;  %v5542_v41 = vld [vmem:[#allocation66_spill] sm:$0xff] }
 0x1c3   : > { %v2070_v44 = vadd.f32 %v2038_v27, %v1791_v34  ;;  %v2071_v53 = vadd.f32 %v2039_v45, %v1792_v60  ;;  %v2176_v31 = vmul.f32 %v4146_v37, %v1178_v22  ;;  %v5538_v58 = vrot.slane %v4191_v29, 1  ;;  %v5541_v27 = vld [vmem:[#allocation59_spill] sm:$0xff] }
 0x1c4   : > { %v5540_v50 = vrot.slane %v4183_v40, 1  ;;  %2981 = vmatprep.mubr.bf16.mxu1 %v2335_v21  ;;  %v2177_v28 = vmul.f32 %v4146_v37, %v1162_v42  ;;  %v1655_v49 = vadd.f32 %v5541_v27, %v4729_v23  ;;  %v1656_v1 = vadd.f32 %v5542_v41, %v4734_v15  ;;  %v5544_v21 = vld [vmem:[#allocation88_spill] sm:$0xff]  ;;  %v5548_v15 = vld [vmem:[#allocation86_spill] sm:$0xff] }
 0x1c5   : > { %v1163_v51 = vsel %vm1152_vm2, %v5538_v58, %v3640_v7  ;;  %v5539_v10 = vmov %v5538_v58  ;;  %v2139_v43 = vadd.f32 %v2107_v3, %v2070_v44  ;;  %v2140_v47 = vadd.f32 %v2108_v2, %v2071_v53  ;;  %v5545_v58 = vld [vmem:[#allocation57_spill] sm:$0xff]  ;;  %v5547_v53 = vld [vmem:[#allocation79_spill] sm:$0xff] }
 0x1c6   : > { %v1179_v0 = vsel %vm1152_vm2, %v5540_v50, %v5539_v10  ;;  %v1349_v22 = vmul.f32 %v4588_v8, %v1163_v51  ;;  %v1764_v42 = vmul.f32 %v4621_v19, %v1163_v51  ;;  %v1724_v10 = vadd.f32 %v5545_v58, %v1655_v49  ;;  %v5546_v50 = vld [vmem:[#allocation67_spill] sm:$0xff]  ;;  %v5552_v58 = vld [vmem:[#allocation69_spill] sm:$0xff] }
 0x1c7   : > { %v1348_v59 = vmul.f32 %v4588_v8, %v1179_v0  ;;  %v1763_v34 = vmul.f32 %v4621_v19, %v1179_v0  ;;  %v2208_v60 = vadd.f32 %v2176_v31, %v2139_v43  ;;  %v2209_v44 = vadd.f32 %v2177_v28, %v2140_v47 }
 0x1c8   : > { %v1381_v3 = vadd.f32 %v1349_v22, %v5544_v21  ;;  %v1725_v2 = vadd.f32 %v5546_v50, %v1656_v1  ;;  %v2040_v23 = vmul.f32 %v4682_v25, %v5547_v53  ;;  %v2041_v41 = vmul.f32 %v4682_v25, %v5548_v15 }
 0x1c9   : > { %v1380_v45 = vadd.f32 %v1348_v59, %v5543_v18  ;;  %v2247_v27 = vadd.f32 %v4161_v52, %v2208_v60  ;;  %v2109_v31 = vmul.f32 %v4691_v9, %v4183_v40  ;;  %v2110_v43 = vmul.f32 %v4691_v9, %v4191_v29  ;;  %v5549_v60 = vld [vmem:[#allocation77_spill] sm:$0xff] }
 0x1ca   : > { %v2248_v28 = vadd.f32 %v4161_v52, %v2209_v44  ;;  %v1793_v59 = vadd.f32 %v1761_v48, %v1724_v10  ;;  %v1794_v22 = vadd.f32 %v1762_v30, %v1725_v2  ;;  %v2178_v47 = vmul.f32 %v4146_v37, %v1179_v0  ;;  %v5554_v2 = vld [vmem:[#allocation82_spill] sm:$0xff] }
 0x1cb   : > { %v2279_v49 = vmax.f32 %v2247_v27, 0.0  ;;  %v2179_v1 = vmul.f32 %v4146_v37, %v1163_v51  ;;  %v5550_v18 = vrot.slane %v5549_v60, 1  ;;  %v5553_v50 = vrot.slane %v5552_v58, 1  ;;  %v5555_v27 = vld [vmem:[#allocation90_spill] sm:$0xff] }
 0x1cc   : > { %v2280_v48 = vmax.f32 %v2248_v28, 0.0  ;;  %v2072_v30 = vadd.f32 %v2040_v23, %v1793_v59  ;;  %v2073_v44 = vadd.f32 %v2041_v41, %v1794_v22  ;;  %v1657_v53 = vadd.f32 %v5554_v2, %v4792_v26  ;;  %v5558_v23 = vld [vmem:[#allocation80_spill] sm:$0xff]  ;;  %v5559_v59 = vld [vmem:[#allocation89_spill] sm:$0xff] }
 0x1cd   : > { %v1164_v21 = vsel %vm1152_vm2, %v5550_v18, %v3640_v7  ;;  %v5551_v40 = vmov %v5550_v18  ;;  %v2311_v10 = vmin.f32 %v2279_v49, 6.0  ;;  %v1658_v15 = vadd.f32 %v5555_v27, %v1379_v57 }
 0x1ce   : > { %v1180_v29 = vsel %vm1152_vm2, %v5553_v50, %v5551_v40  ;;  %v1351_v51 = vmul.f32 %v4588_v8, %v1164_v21  ;;  %v2312_v18 = vmin.f32 %v2280_v48, 6.0  ;;  %v2141_v56 = vadd.f32 %v2109_v31, %v2072_v30  ;;  %v5557_v40 = vld [vmem:[#allocation87_spill] sm:$0xff]  ;;  %v5561_v30 = vld [vmem:[#allocation81_spill] sm:$0xff] }
 0x1cf   : > { %v1350_v0 = vmul.f32 %v4588_v8, %v1180_v29  ;;  %v2142_v4 = vadd.f32 %v2110_v43, %v2073_v44  ;;  %v1726_v41 = vadd.f32 %v5558_v23, %v1657_v53  ;;  %v1727_v22 = vadd.f32 %v5559_v59, %v1658_v15  ;;  %v5560_v43 = vld [vmem:[#allocation74_spill] sm:$0xff] }
 0x1d0   : > { %v4880_v28 = vadd.f32 %v1351_v51, %v5557_v40  ;;  %v1765_v49 = vmul.f32 %v4621_v19, %v1180_v29  ;;  %v2336_v50 = vpack.c.bf16 %v2312_v18, %v2311_v10  ;;  %v2210_v24 = vadd.f32 %v2178_v47, %v2141_v56 }
 0x1d1   : > { %v4877_v6 = vadd.f32 %v1350_v0, %v5556_v5  ;;  %v2211_v26 = vadd.f32 %v2179_v1, %v2142_v4  ;;  %v1766_v57 = vmul.f32 %v4621_v19, %v1164_v21  ;;  %v1795_v48 = vadd.f32 %v1763_v34, %v1726_v41  ;;  %v5565_v41 = vld [vmem:[#allocation76_spill] sm:$0xff] }
 0x1d2   : > { %v1796_v31 = vadd.f32 %v1764_v42, %v1727_v22  ;;  %v2042_v5 = vmul.f32 %v4682_v25, %v5560_v43  ;;  %v2043_v44 = vmul.f32 %v4682_v25, %v5561_v30  ;;  %2982 = vmatmul.mubr.bf16.gmra.mxu1 %v2336_v50  ;;  %v2249_v0 = vadd.f32 %v4161_v52, %v2210_v24  ;;  %v5566_v22 = vld [vmem:[#allocation85_spill] sm:$0xff]  ;;  %v5567_v30 = vld [vmem:[#allocation75_spill] sm:$0xff] }
 0x1d3   : > { %v2250_v51 = vadd.f32 %v4161_v52, %v2211_v26  ;;  %v2111_v10 = vmul.f32 %v4691_v9, %v5552_v58  ;;  %v2112_v4 = vmul.f32 %v4691_v9, %v5549_v60  ;;  %v2180_v42 = vmul.f32 %v4146_v37, %v1180_v29 }
 0x1d4   : > { %v2074_v56 = vadd.f32 %v2042_v5, %v1795_v48  ;;  %v2075_v34 = vadd.f32 %v2043_v44, %v1796_v31  ;;  %v2181_v47 = vmul.f32 %v4146_v37, %v1164_v21  ;;  %v2281_v1 = vmax.f32 %v2249_v0, 0.0  ;;  %v5568_v0 = vld [vmem:[#allocation83_spill] sm:$0xff] }
 0x1d5   : > { %v2282_v2 = vmax.f32 %v2250_v51, 0.0  ;;  %v5562_v53 = vrot.slane %v4406_v54, 1  ;;  %v5564_v58 = vrot.slane %v4291_v39, 1  ;;  %v1659_v59 = vadd.f32 %v5565_v41, %v1380_v45 }
 0x1d6   : > { %v2143_v15 = vadd.f32 %v2111_v10, %v2074_v56  ;;  %v2144_v18 = vadd.f32 %v2112_v4, %v2075_v34  ;;  %v2313_v40 = vmin.f32 %v2281_v1, 6.0  ;;  %v1660_v50 = vadd.f32 %v5566_v22, %v1381_v3 }
 0x1d7   : > { %v1165_v24 = vsel %vm1152_vm2, %v5562_v53, %v3640_v7  ;;  %v5563_v27 = vmov %v5562_v53  ;;  %v2314_v23 = vmin.f32 %v2282_v2, 6.0  ;;  %v1728_v44 = vadd.f32 %v5567_v30, %v1659_v59 }
 0x1d8   : > { %v1181_v60 = vsel %vm1152_vm2, %v5564_v58, %v5563_v27  ;;  %v1353_v21 = vmul.f32 %v4588_v8, %v1165_v24  ;;  %v2212_v26 = vadd.f32 %v2180_v42, %v2143_v15  ;;  %v2213_v48 = vadd.f32 %v2181_v47, %v2144_v18 }
 0x1d9   : > { %v1352_v29 = vmul.f32 %v4588_v8, %v1181_v60  ;;  %v2337_v5 = vpack.c.bf16 %v2314_v23, %v2313_v40  ;;  %v1729_v51 = vadd.f32 %v5568_v0, %v1660_v50  ;;  %v1767_v10 = vmul.f32 %v4621_v19, %v1181_v60 }
 0x1da   : > { %v4915_v43 = vadd.f32 %v1353_v21, %v4454_v14  ;;  %v2251_v4 = vadd.f32 %v4161_v52, %v2212_v26  ;;  %v2252_v45 = vadd.f32 %v4161_v52, %v2213_v48  ;;  %v1768_v3 = vmul.f32 %v4621_v19, %v1165_v24  ;;  %v5572_v26 = vld [vmem:[#allocation93_spill] sm:$0xff] }
 0x1db   : > { %v1384_v31 = vadd.f32 %v1352_v29, %v4394_v62  ;;  %v2044_v56 = vmul.f32 %v4682_v25, %v4324_v55  ;;  %2985 = vmatprep.mubr.bf16.mxu1 %v2337_v5  ;;  %v1797_v62 = vadd.f32 %v1765_v49, %v1728_v44  ;;  %v1798_v14 = vadd.f32 %v1766_v57, %v1729_v51  ;;  %v5573_v5 = vld [vmem:[#allocation95_spill] sm:$0xff] }
 0x1dc   : > { %v2045_v34 = vmul.f32 %v4682_v25, %v4440_v32  ;;  %v2113_v42 = vmul.f32 %v4691_v9, %v4291_v39  ;;  %v2283_v47 = vmax.f32 %v2251_v4, 0.0  ;;  %v2284_v1 = vmax.f32 %v2252_v45, 0.0 }
 0x1dd   : > { %v2114_v2 = vmul.f32 %v4691_v9, %v4406_v54  ;;  %v2182_v53 = vmul.f32 %v4146_v37, %v1181_v60  ;;  %v2076_v27 = vadd.f32 %v2044_v56, %v1797_v62  ;;  %v2183_v55 = vmul.f32 %v4146_v37, %v1165_v24  ;;  %v4969_v62 = vld [vmem:[%s5271_s5 + $0xa] ss:$0 sm:$0xff] }
 0x1de   : > { %v2077_v58 = vadd.f32 %v2045_v34, %v1798_v14  ;;  %v5569_v49 = vrot.slane %v4398_v20, 1  ;;  %v2315_v57 = vmin.f32 %v2283_v47, 6.0  ;;  %v2316_v15 = vmin.f32 %v2284_v1, 6.0  ;;  %v5578_v1 = vld [vmem:[#allocation24_spill] sm:$0xff] }
 0x1df   : > { %v5571_v18 = vrot.slane %v4246_v38, 1  ;;  %v2145_v29 = vadd.f32 %v2113_v42, %v2076_v27  ;;  %v1661_v24 = vadd.f32 %v4367_v16, %v4877_v6  ;;  %v1662_v41 = vadd.f32 %v4495_v46, %v4880_v28  ;;  %v5574_v16 = vld [vmem:[#allocation91_spill] sm:$0xff] }
 0x1e0   : > { %v1166_v32 = vsel %vm1152_vm2, %v5569_v49, %v3640_v7  ;;  %v5570_v39 = vmov %v5569_v49  ;;  %v2146_v21 = vadd.f32 %v2114_v2, %v2077_v58  ;;  %v2338_v40 = vpack.c.bf16 %v2316_v15, %v2315_v57  ;;  %v5580_v58 = vld [vmem:[#allocation94_spill] sm:$0xff] }
 0x1e1   : > { %v1182_v54 = vsel %vm1152_vm2, %v5571_v18, %v5570_v39  ;;  %v1355_v60 = vmul.f32 %v4588_v8, %v1166_v32  ;;  %v2214_v22 = vadd.f32 %v2182_v53, %v2145_v29  ;;  %v1730_v30 = vadd.f32 %v5573_v5, %v1661_v24  ;;  %v5581_v18 = vld [vmem:[#allocation51_spill] sm:$0xff] }
 0x1e2   : > { %v1354_v37 = vmul.f32 %v4588_v8, %v1182_v54  ;;  %v1769_v59 = vmul.f32 %v4621_v19, %v1182_v54  ;;  %v2215_v50 = vadd.f32 %v2183_v55, %v2146_v21  ;;  %2986 = vmatmul.mubr.bf16.gmra.mxu1 %v2338_v40  ;;  %v1731_v44 = vadd.f32 %v4448_v17, %v1662_v41  ;;  %v5583_v21 = vld [vmem:[#allocation92_spill] sm:$0xff]  ;;  %v5584_v41 = vld [vmem:[#allocation43_spill] sm:$0xff] }
 0x1e3   : > { %v1387_v23 = vadd.f32 %v1355_v60, %v4450_v35  ;;  %v1770_v0 = vmul.f32 %v4621_v19, %v1166_v32  ;;  %v2046_v6 = vmul.f32 %v4682_v25, %v5574_v16  ;;  %v5575_v35 = vld [vmem:[#allocation25_spill] sm:$0xff]  ;;  %v2253_v46 = vadd.f32 %v4161_v52, %v2214_v22  ;;  %v5582_v60 = vld [vmem:[#allocation27_spill] sm:$0xff] }
 0x1e4   : > { %v1386_v48 = vadd.f32 %v1354_v37, %v5572_v26  ;;  %v2047_v51 = vmul.f32 %v4682_v25, %v5575_v35  ;;  %v2254_v28 = vadd.f32 %v4161_v52, %v2215_v50  ;;  %v1799_v4 = vadd.f32 %v1767_v10, %v1730_v30  ;;  %v5585_v26 = vld [vmem:[#allocation29_spill] sm:$0xff]  ;;  %v5586_v16 = vld [vmem:[#allocation23_spill] sm:$0xff]  ;;  %v5587_v35 = vld [vmem:[#allocation48_spill] sm:$0xff] }
 0x1e5   : > { %v2115_v45 = vmul.f32 %v4691_v9, %v4246_v38  ;;  %v1800_v56 = vadd.f32 %v1768_v3, %v1731_v44  ;;  %v2116_v17 = vmul.f32 %v4691_v9, %v4398_v20  ;;  %v2184_v14 = vmul.f32 %v4969_v62, %v1182_v54  ;;  %v4998_v44 = vld [vmem:[%s5272_s6] ss:$0 sm:$0xff] }
 0x1e6   : > { %v2185_v34 = vmul.f32 %v4969_v62, %v1166_v32  ;;  %v2285_v42 = vmax.f32 %v2253_v46, 0.0  ;;  %v2286_v47 = vmax.f32 %v2254_v28, 0.0  ;;  %v2078_v52 = vadd.f32 %v2046_v6, %v1799_v4 }
 0x1e7   : > { %v5576_v10 = vrot.slane %v4598_v61, 1  ;;  %v2079_v3 = vadd.f32 %v2047_v51, %v1800_v56  ;;  %v5579_v2 = vrot.slane %v5578_v1, 1  ;;  %v1663_v55 = vadd.f32 %v5580_v58, %v1384_v31 }
 0x1e8   : > { %v2317_v49 = vmin.f32 %v2285_v42, 6.0  ;;  %v2318_v32 = vmin.f32 %v2286_v47, 6.0  ;;  %v2147_v57 = vadd.f32 %v2115_v45, %v2078_v52  ;;  %v1664_v29 = vadd.f32 %v5582_v60, %v4915_v43 }
 0x1e9   : > { %v1167_v38 = vsel %vm1152_vm2, %v5576_v10, %v3640_v7  ;;  %v5577_v20 = vmov %v5576_v10  ;;  %v2148_v39 = vadd.f32 %v2116_v17, %v2079_v3  ;;  %v1732_v37 = vadd.f32 %v5583_v21, %v1663_v55  ;;  %v5589_v10 = vld [vmem:[#allocation40_spill] sm:$0xff] }
 0x1ea   : > { %v1183_v53 = vsel %vm1152_vm2, %v5579_v2, %v5577_v20  ;;  %v1357_v27 = vmul.f32 %v4588_v8, %v1167_v38  ;;  %v2339_v24 = vpack.c.bf16 %v2318_v32, %v2317_v49  ;;  %v2216_v40 = vadd.f32 %v2184_v14, %v2147_v57  ;;  %v5590_v20 = vld [vmem:[#allocation28_spill] sm:$0xff]  ;;  %v5593_v32 = vld [vmem:[#allocation21_spill] sm:$0xff] }
 0x1eb   : > { %v1356_v15 = vmul.f32 %v4588_v8, %v1183_v53  ;;  %v1771_v50 = vmul.f32 %v4621_v19, %v1183_v53  ;;  %v2217_v31 = vadd.f32 %v2185_v34, %v2148_v39  ;;  %v1733_v5 = vadd.f32 %v5585_v26, %v1664_v29  ;;  %v5588_v34 = vld [vmem:[#allocation32_spill] sm:$0xff] }
 0x1ec   : > { %v1389_v54 = vadd.f32 %v1357_v27, %v5581_v18  ;;  %v1772_v30 = vmul.f32 %v4621_v19, %v1167_v38  ;;  %v1801_v8 = vadd.f32 %v1769_v59, %v1732_v37  ;;  %2989 = vmatprep.mubr.bf16.mxu1 %v2339_v24  ;;  %v2255_v43 = vadd.f32 %v4998_v44, %v2216_v40  ;;  %v5591_v27 = vld [vmem:[#allocation22_spill] sm:$0xff] }
 0x1ed   : > { %v1388_v22 = vadd.f32 %v1356_v15, %v5584_v41  ;;  %v2048_v6 = vmul.f32 %v4682_v25, %v5586_v16  ;;  %v2049_v51 = vmul.f32 %v4682_v25, %v5587_v35  ;;  %v2117_v46 = vmul.f32 %v4691_v9, %v5578_v1  ;;  %v5595_v18 = vld [vmem:[#allocation26_spill] sm:$0xff] }
 0x1ee   : > { %v2256_v28 = vadd.f32 %v4998_v44, %v2217_v31  ;;  %v1802_v59 = vadd.f32 %v1770_v0, %v1733_v5  ;;  %v2118_v4 = vmul.f32 %v4691_v9, %v4598_v61  ;;  %v2186_v45 = vmul.f32 %v4969_v62, %v1183_v53  ;;  %v5592_v61 = vld [vmem:[#allocation34_spill] sm:$0xff] }
 0x1ef   : > { %v2287_v56 = vmax.f32 %v2255_v43, 0.0  ;;  %v2080_v17 = vadd.f32 %v2048_v6, %v1801_v8  ;;  %v2187_v14 = vmul.f32 %v4969_v62, %v1167_v38  ;;  %v1665_v42 = vadd.f32 %v5588_v34, %v1386_v48  ;;  %v5599_v43 = vld [vmem:[#allocation30_spill] sm:$0xff] }
 0x1f0   : > { %v2288_v47 = vmax.f32 %v2256_v28, 0.0  ;;  %v2081_v52 = vadd.f32 %v2049_v51, %v1802_v59  ;;  %v1666_v3 = vadd.f32 %v5589_v10, %v1387_v23  ;;  %v2050_v1 = vmul.f32 %v4682_v25, %v5590_v20  ;;  %v5594_v23 = vld [vmem:[#allocation64_spill] sm:$0xff]  ;;  %v5600_v6 = vld [vmem:[#allocation58_spill] sm:$0xff] }
 0x1f1   : > { %v2319_v2 = vmin.f32 %v2287_v56, 6.0  ;;  %v2149_v0 = vadd.f32 %v2117_v46, %v2080_v17  ;;  %v1734_v58 = vadd.f32 %v5591_v27, %v1665_v42  ;;  %v2051_v53 = vmul.f32 %v4682_v25, %v5592_v61  ;;  %v5602_v56 = vld [vmem:[#allocation31_spill] sm:$0xff] }
 0x1f2   : > { %v2320_v55 = vmin.f32 %v2288_v47, 6.0  ;;  %v2150_v49 = vadd.f32 %v2118_v4, %v2081_v52  ;;  %v1735_v38 = vadd.f32 %v4724_v36, %v1666_v3  ;;  %v2119_v48 = vmul.f32 %v4691_v9, %v5593_v32 }
 0x1f3   : > { %v2218_v57 = vadd.f32 %v2186_v45, %v2149_v0  ;;  %v1803_v15 = vadd.f32 %v1771_v50, %v1734_v58  ;;  %v2120_v39 = vmul.f32 %v4691_v9, %v5594_v23  ;;  %v2188_v60 = vmul.f32 %v4969_v62, %v5595_v18  ;;  %v5605_v0 = vld [vmem:[#allocation56_spill] sm:$0xff] }
 0x1f4   : > { %v2340_v29 = vpack.c.bf16 %v2320_v55, %v2319_v2  ;;  %v2219_v21 = vadd.f32 %v2187_v14, %v2150_v49  ;;  %v1804_v37 = vadd.f32 %v1772_v30, %v1735_v38  ;;  %v2189_v24 = vmul.f32 %v4969_v62, %v4648_v13  ;;  %v5603_v14 = vld [vmem:[#allocation39_spill] sm:$0xff] }
 0x1f5   : > { %v2257_v40 = vadd.f32 %v4998_v44, %v2218_v57  ;;  %v2082_v36 = vadd.f32 %v2050_v1, %v1803_v15  ;;  %v5596_v41 = vrot.slane %v4782_v33, 1  ;;  %v5598_v26 = vrot.slane %v4726_v63, 1  ;;  %v5604_v1 = vld [vmem:[#allocation35_spill] sm:$0xff]  ;;  %v5607_v15 = vld [vmem:[#allocation20_spill] sm:$0xff] }
 0x1f6   : > { %2990 = vmatmul.mubr.bf16.gmra.mxu1 %v2340_v29  ;;  %v2258_v30 = vadd.f32 %v4998_v44, %v2219_v21  ;;  %v2083_v8 = vadd.f32 %v2051_v53, %v1804_v37  ;;  %v1667_v16 = vadd.f32 %v5599_v43, %v1388_v22  ;;  %v1668_v35 = vadd.f32 %v5600_v6, %v1389_v54  ;;  %v5606_v53 = vld [vmem:[#allocation44_spill] sm:$0xff] }
 0x1f7   : > { %v1584_v50 = vsel %vm1152_vm2, %v5596_v41, %v3640_v7  ;;  %v5597_v31 = vmov %v5596_v41  ;;  %v2289_v51 = vmax.f32 %v2257_v40, 0.0  ;;  %v2151_v46 = vadd.f32 %v2119_v48, %v2082_v36 }
 0x1f8   : > { %v1600_v5 = vsel %vm1152_vm2, %v5598_v26, %v5597_v31  ;;  %v1773_v28 = vmul.f32 %v4621_v19, %v5595_v18  ;;  %v1774_v59 = vmul.f32 %v4621_v19, %v4648_v13  ;;  %v2290_v63 = vmax.f32 %v2258_v30, 0.0  ;;  %v5608_v18 = vld [vmem:[#allocation33_spill] sm:$0xff] }
 0x1f9   : > { %v2152_v4 = vadd.f32 %v2120_v39, %v2083_v8  ;;  %v1736_v45 = vadd.f32 %v5601_v12, %v1667_v16  ;;  %v1737_v17 = vadd.f32 %v5602_v56, %v1668_v35  ;;  %v1739_v34 = vadd.f32 %v5603_v14, %v4819_v11  ;;  %v5077_v12 = vld [vmem:[%s5274_s8] ss:$0 sm:$0xff] }
 0x1fa   : > { %v2321_v22 = vmin.f32 %v2289_v51, 6.0  ;;  %v2220_v42 = vadd.f32 %v2188_v60, %v2151_v46  ;;  %v1775_v54 = vmul.f32 %v4621_v19, %v1600_v5  ;;  %v2322_v47 = vmin.f32 %v2290_v63, 6.0 }
 0x1fb   : > { %v2221_v52 = vadd.f32 %v2189_v24, %v2152_v4  ;;  %v1805_v10 = vadd.f32 %v1773_v28, %v1736_v45  ;;  %v1806_v3 = vadd.f32 %v1774_v59, %v1737_v17  ;;  %v1776_v13 = vmul.f32 %v4621_v19, %v1584_v50  ;;  %v3115_v17 = vld [vmem:[%s3535_s19 + $0x10] sm:$0xff] }
 0x1fc   : > { %v2259_v20 = vadd.f32 %v4998_v44, %v2220_v42  ;;  %v2052_v2 = vmul.f32 %v4682_v25, %v5604_v1  ;;  %v2053_v27 = vmul.f32 %v4682_v25, %v5605_v0  ;;  %v2122_v11 = vmul.f32 %v4691_v9, %v4782_v33  ;;  %v3116_v42 = vld [vmem:[%s3535_s19] sm:$0xff] }
 0x1fd   : > { %v2341_v58 = vpack.c.bf16 %v2322_v47, %v2321_v22  ;;  %v2260_v61 = vadd.f32 %v4998_v44, %v2221_v52  ;;  %v1807_v55 = vadd.f32 %v1775_v54, %v5606_v53  ;;  %v1808_v48 = vadd.f32 %v1776_v13, %v1739_v34  ;;  %v3118_v13 = vld [vmem:[%s3535_s19 + $0x8] sm:$0xff] }
 0x1fe   : > { %v2291_v49 = vmax.f32 %v2259_v20, 0.0  ;;  %v2084_v38 = vadd.f32 %v2052_v2, %v1805_v10  ;;  %v2085_v32 = vadd.f32 %v2053_v27, %v1806_v3  ;;  %v2190_v57 = vmul.f32 %v4969_v62, %v1600_v5  ;;  %v3117_v10 = vld [vmem:[%s3535_s19 + $0x18] sm:$0xff] }
 0x1ff   : > { %2993 = vmatprep.mubr.bf16.mxu1 %v2341_v58  ;;  %v2292_v19 = vmax.f32 %v2260_v61, 0.0  ;;  %v2054_v23 = vmul.f32 %v4682_v25, %v5607_v15  ;;  %v2123_v39 = vmul.f32 0.0, %v4691_v9  ;;  %v2191_v29 = vmul.f32 %v4969_v62, %v1584_v50  ;;  %v3122_v15 = vld [vmem:[%s3535_s19 + $0x28] sm:$0xff] }
 0x200   : > { %v2153_v33 = vadd.f32 %v5608_v18, %v2084_v38  ;;  %v2154_v60 = vadd.f32 %v2122_v11, %v2085_v32  ;;  %v2192_v21 = vmul.f32 %v4969_v62, %v3640_v7  ;;  %v2323_v37 = vmin.f32 %v2291_v49, 6.0  ;;  %v3119_v11 = vld [vmem:[%s3535_s19 + $0x30] sm:$0xff] }
 0x201   : > { %v2324_v24 = vmin.f32 %v2292_v19, 6.0  ;;  %v2086_v40 = vadd.f32 %v2054_v23, %v1807_v55  ;;  %v2087_v36 = vadd.f32 %v2054_v23, %v1808_v48  ;;  %v3120_v55 = vld [vmem:[%s3535_s19 + $0x20] sm:$0xff]  ;;  %v3121_v48 = vld [vmem:[%s3535_s19 + $0x38] sm:$0xff] }
 0x202   : > { %v2222_v41 = vadd.f32 %v2190_v57, %v2153_v33  ;;  %v2223_v31 = vadd.f32 %v2191_v29, %v2154_v60  ;;  %v3123_v60 = vld [vmem:[%s3535_s19 + $0x50] sm:$0xff] }
 0x203   : > { %v2342_v26 = vpack.c.bf16 %v2324_v24, %v2323_v37  ;;  %v2155_v5 = vadd.f32 %v2123_v39, %v2086_v40  ;;  %v2156_v30 = vadd.f32 %v2123_v39, %v2087_v36  ;;  %v3124_v24 = vld [vmem:[%s3535_s19 + $0x40] sm:$0xff] }
 0x204   : > { %v2261_v25 = vadd.f32 %v4998_v44, %v2222_v41  ;;  %v2262_v9 = vadd.f32 %v4998_v44, %v2223_v31  ;;  %v3125_v31 = vld [vmem:[%s3535_s19 + $0x58] sm:$0xff] }
 0x205   : > { %2994 = vmatmul.mubr.bf16.gmra.mxu1 %v2342_v26  ;;  %v2224_v8 = vadd.f32 %v2192_v21, %v2155_v5  ;;  %v2225_v43 = vadd.f32 %v2192_v21, %v2156_v30  ;;  %v3126_v30 = vld [vmem:[%s3535_s19 + $0x48] sm:$0xff] }
 0x206   : > { %v2293_v50 = vmax.f32 %v2261_v25, 0.0  ;;  %v2294_v16 = vmax.f32 %v2262_v9, 0.0 }
 0x207   : > { %v2263_v7 = vadd.f32 %v4998_v44, %v2224_v8  ;;  %v2264_v62 = vadd.f32 %v4998_v44, %v2225_v43 }
 0x208   : > { %v2325_v6 = vmin.f32 %v2293_v50, 6.0  ;;  %v2326_v35 = vmin.f32 %v2294_v16, 6.0  ;;  %v3127_v50 = vld [vmem:[%s3535_s19 + $0x70] sm:$0xff] }
 0x209   : > { %v2295_v51 = vmax.f32 %v2263_v7, 0.0  ;;  %v2296_v46 = vmax.f32 %v2264_v62, 0.0 }
 0x20a   : > { %v2343_v28 = vpack.c.bf16 %v2326_v35, %v2325_v6  ;;  %v3128_v6 = vld [vmem:[%s3535_s19 + $0x60] sm:$0xff] }
 0x20b   : > { %v2327_v59 = vmin.f32 %v2295_v51, 6.0  ;;  %v2328_v63 = vmin.f32 %v2296_v46, 6.0 }
 0x20c   : > { %2997 = vmatprep.mubr.bf16.mxu1 %v2343_v28  ;;  %v3129_v28 = vld [vmem:[%s3535_s19 + $0x78] sm:$0xff] }
 0x20d   : > { %v2344_v4 = vpack.c.bf16 %v2328_v63, %v2327_v59 }
 0x20f   : > { %2998 = vmatmul.mubr.bf16.gmra.mxu1 %v2344_v4  ;;  %v3130_v4 = vld [vmem:[%s3535_s19 + $0x68] sm:$0xff] }
 0x236   : > { %v2971_v45 = vpop.f32.mrf.mxu0 }
 0x237   : > { %v2459_v44 = vadd.f32 %v2971_v45, %v5077_v12 }
 0x238   : > { %v2450_v56 = vpop.f32.mrf.mxu0 }
 0x239   : > { %v2579_v14 = vadd.f32 %v3115_v17, %v2459_v44  ;;  %v2451_v34 = vadd.f32 %v5077_v12, %v2450_v56 }
 0x23a   : > { %v2972_v22 = vpop.f32.mrf.mxu0 }
 0x23b   : > { %2611 = vst.msk [vmem:[%s5084_s11 + $0x10] sm:$0xff] %vm567_vm0, %v2579_v14  ;;  %v2577_v54 = vadd.f32 %v3116_v42, %v2451_v34  ;;  %v2462_v47 = vadd.f32 %v2972_v22, %v5077_v12  ;;  %v3131_v14 = vld [vmem:[%s3535_s19 + $0x90] sm:$0xff] }
 0x23c   : > { %v2453_v52 = vpop.f32.mrf.mxu0 }
 0x23d   : > { %2609 = vst.msk [vmem:[%s5084_s11] sm:$0xff] %vm567_vm0, %v2577_v54  ;;  %v2580_v3 = vadd.f32 %v3117_v10, %v2462_v47  ;;  %v2454_v20 = vadd.f32 %v5077_v12, %v2453_v52  ;;  %v3132_v54 = vld [vmem:[%s3535_s19 + $0x80] sm:$0xff] }
 0x23f   : > { %2612 = vst.msk [vmem:[%s5084_s11 + $0x18] sm:$0xff] %vm567_vm0, %v2580_v3  ;;  %v2578_v1 = vadd.f32 %v3118_v13, %v2454_v20  ;;  %v3133_v3 = vld [vmem:[%s3535_s19 + $0x98] sm:$0xff] }
 0x241   : > { %2610 = vst.msk [vmem:[%s5084_s11 + $0x8] sm:$0xff] %vm567_vm0, %v2578_v1  ;;  %v3134_v1 = vld [vmem:[%s3535_s19 + $0x88] sm:$0xff] }
 0x25c   : > { %v2975_v2 = vpop.f32.mrf.mxu1 }
 0x25d   : > { %v2475_v0 = vadd.f32 %v2975_v2, %v5077_v12 }
 0x25e   : > { %v2466_v27 = vpop.f32.mrf.mxu1 }
 0x25f   : > { %v2583_v58 = vadd.f32 %v3119_v11, %v2475_v0  ;;  %v2467_v61 = vadd.f32 %v5077_v12, %v2466_v27 }
 0x260   : > { %v2976_v53 = vpop.f32.mrf.mxu1 }
 0x261   : > { %2615 = vst.msk [vmem:[%s5084_s11 + $0x30] sm:$0xff] %vm567_vm0, %v2583_v58  ;;  %v2581_v49 = vadd.f32 %v3120_v55, %v2467_v61  ;;  %v2478_v38 = vadd.f32 %v2976_v53, %v5077_v12  ;;  %v3135_v58 = vld [vmem:[%s3535_s19 + $0xb0] sm:$0xff] }
 0x262   : > { %v2469_v32 = vpop.f32.mrf.mxu1 }
 0x263   : > { %2613 = vst.msk [vmem:[%s5084_s11 + $0x20] sm:$0xff] %vm567_vm0, %v2581_v49  ;;  %v2584_v19 = vadd.f32 %v3121_v48, %v2478_v38  ;;  %v2470_v57 = vadd.f32 %v5077_v12, %v2469_v32  ;;  %v3136_v49 = vld [vmem:[%s3535_s19 + $0xa0] sm:$0xff] }
 0x265   : > { %2616 = vst.msk [vmem:[%s5084_s11 + $0x38] sm:$0xff] %vm567_vm0, %v2584_v19  ;;  %v2582_v23 = vadd.f32 %v3122_v15, %v2470_v57  ;;  %v3137_v19 = vld [vmem:[%s3535_s19 + $0xb8] sm:$0xff] }
 0x267   : > { %2614 = vst.msk [vmem:[%s5084_s11 + $0x28] sm:$0xff] %vm567_vm0, %v2582_v23  ;;  %v3138_v23 = vld [vmem:[%s3535_s19 + $0xa8] sm:$0xff] }
 0x27b   : > { %v2979_v39 = vpop.f32.mrf.mxu1 }
 0x27c   : > { %v2491_v18 = vadd.f32 %v2979_v39, %v5077_v12 }
 0x27d   : > { %v2482_v33 = vpop.f32.mrf.mxu1 }
 0x27e   : > { %v2587_v29 = vadd.f32 %v3123_v60, %v2491_v18  ;;  %v2483_v21 = vadd.f32 %v5077_v12, %v2482_v33 }
 0x27f   : > { %v2980_v37 = vpop.f32.mrf.mxu1 }
 0x280   : > { %2619 = vst.msk [vmem:[%s5084_s11 + $0x50] sm:$0xff] %vm567_vm0, %v2587_v29  ;;  %v2585_v40 = vadd.f32 %v3124_v24, %v2483_v21  ;;  %v2494_v36 = vadd.f32 %v2980_v37, %v5077_v12  ;;  %v3139_v29 = vld [vmem:[%s3535_s19 + $0xd0] sm:$0xff] }
 0x281   : > { %v2485_v41 = vpop.f32.mrf.mxu1 }
 0x282   : > { %2617 = vst.msk [vmem:[%s5084_s11 + $0x40] sm:$0xff] %vm567_vm0, %v2585_v40  ;;  %v2588_v26 = vadd.f32 %v3125_v31, %v2494_v36  ;;  %v2486_v5 = vadd.f32 %v5077_v12, %v2485_v41  ;;  %v3140_v40 = vld [vmem:[%s3535_s19 + $0xc0] sm:$0xff] }
 0x284   : > { %2620 = vst.msk [vmem:[%s5084_s11 + $0x58] sm:$0xff] %vm567_vm0, %v2588_v26  ;;  %v2586_v25 = vadd.f32 %v3126_v30, %v2486_v5  ;;  %v3141_v26 = vld [vmem:[%s3535_s19 + $0xd8] sm:$0xff] }
 0x286   : > { %2618 = vst.msk [vmem:[%s5084_s11 + $0x48] sm:$0xff] %vm567_vm0, %v2586_v25  ;;  %v3142_v25 = vld [vmem:[%s3535_s19 + $0xc8] sm:$0xff] }
 0x292   : > { %v2983_v9 = vpop.f32.mrf.mxu1 }
 0x293   : > { %v2507_v8 = vadd.f32 %v2983_v9, %v5077_v12 }
 0x294   : > { %v2498_v43 = vpop.f32.mrf.mxu1 }
 0x295   : > { %v2591_v16 = vadd.f32 %v3127_v50, %v2507_v8  ;;  %v2499_v7 = vadd.f32 %v5077_v12, %v2498_v43 }
 0x296   : > { %v2984_v62 = vpop.f32.mrf.mxu1 }
 0x297   : > { %2623 = vst.msk [vmem:[%s5084_s11 + $0x70] sm:$0xff] %vm567_vm0, %v2591_v16  ;;  %v2589_v35 = vadd.f32 %v3128_v6, %v2499_v7  ;;  %v2510_v51 = vadd.f32 %v2984_v62, %v5077_v12  ;;  %v3143_v16 = vld [vmem:[%s3535_s19 + $0xf0] sm:$0xff] }
 0x298   : > { %v2501_v46 = vpop.f32.mrf.mxu1 }
 0x299   : > { %2621 = vst.msk [vmem:[%s5084_s11 + $0x60] sm:$0xff] %vm567_vm0, %v2589_v35  ;;  %v2592_v59 = vadd.f32 %v3129_v28, %v2510_v51  ;;  %v2502_v63 = vadd.f32 %v5077_v12, %v2501_v46  ;;  %v3144_v35 = vld [vmem:[%s3535_s19 + $0xe0] sm:$0xff] }
 0x29b   : > { %2624 = vst.msk [vmem:[%s5084_s11 + $0x78] sm:$0xff] %vm567_vm0, %v2592_v59  ;;  %v2590_v45 = vadd.f32 %v3130_v4, %v2502_v63  ;;  %v3145_v59 = vld [vmem:[%s3535_s19 + $0xf8] sm:$0xff] }
 0x29d   : > { %2622 = vst.msk [vmem:[%s5084_s11 + $0x68] sm:$0xff] %vm567_vm0, %v2590_v45  ;;  %v3146_v45 = vld [vmem:[%s3535_s19 + $0xe8] sm:$0xff] }
 0x2a2   : > { %v2987_v44 = vpop.f32.mrf.mxu1 }
 0x2a3   : > { %v2523_v56 = vadd.f32 %v2987_v44, %v5077_v12 }
 0x2a4   : > { %v2514_v17 = vpop.f32.mrf.mxu1 }
 0x2a5   : > { %v2595_v34 = vadd.f32 %v3131_v14, %v2523_v56  ;;  %v2515_v22 = vadd.f32 %v5077_v12, %v2514_v17 }
 0x2a6   : > { %v2988_v42 = vpop.f32.mrf.mxu1 }
 0x2a7   : > { %2627 = vst.msk [vmem:[%s5084_s11 + $0x90] sm:$0xff] %vm567_vm0, %v2595_v34  ;;  %v2593_v47 = vadd.f32 %v3132_v54, %v2515_v22  ;;  %v2526_v52 = vadd.f32 %v2988_v42, %v5077_v12 }
 0x2a8   : > { %v2517_v10 = vpop.f32.mrf.mxu1 }
 0x2a9   : > { %2625 = vst.msk [vmem:[%s5084_s11 + $0x80] sm:$0xff] %vm567_vm0, %v2593_v47  ;;  %v2596_v20 = vadd.f32 %v3133_v3, %v2526_v52  ;;  %v2518_v13 = vadd.f32 %v5077_v12, %v2517_v10 }
 0x2ab   : > { %2628 = vst.msk [vmem:[%s5084_s11 + $0x98] sm:$0xff] %vm567_vm0, %v2596_v20  ;;  %v2594_v2 = vadd.f32 %v3134_v1, %v2518_v13 }
 0x2ad   : > { %2626 = vst.msk [vmem:[%s5084_s11 + $0x88] sm:$0xff] %vm567_vm0, %v2594_v2 }
 0x2b6   : > { %v2991_v0 = vpop.f32.mrf.mxu1 }
 0x2b7   : > { %v2539_v27 = vadd.f32 %v2991_v0, %v5077_v12 }
 0x2b8   : > { %v2530_v11 = vpop.f32.mrf.mxu1 }
 0x2b9   : > { %v2599_v61 = vadd.f32 %v3135_v58, %v2539_v27  ;;  %v2531_v53 = vadd.f32 %v5077_v12, %v2530_v11 }
 0x2ba   : > { %v2992_v55 = vpop.f32.mrf.mxu1 }
 0x2bb   : > { %2631 = vst.msk [vmem:[%s5084_s11 + $0xb0] sm:$0xff] %vm567_vm0, %v2599_v61  ;;  %v2597_v38 = vadd.f32 %v3136_v49, %v2531_v53  ;;  %v2542_v32 = vadd.f32 %v2992_v55, %v5077_v12 }
 0x2bc   : > { %v2533_v48 = vpop.f32.mrf.mxu1 }
 0x2bd   : > { %2629 = vst.msk [vmem:[%s5084_s11 + $0xa0] sm:$0xff] %vm567_vm0, %v2597_v38  ;;  %v2600_v57 = vadd.f32 %v3137_v19, %v2542_v32  ;;  %v2534_v15 = vadd.f32 %v5077_v12, %v2533_v48 }
 0x2bf   : > { %2632 = vst.msk [vmem:[%s5084_s11 + $0xb8] sm:$0xff] %vm567_vm0, %v2600_v57  ;;  %v2598_v39 = vadd.f32 %v3138_v23, %v2534_v15 }
 0x2c1   : > { %2630 = vst.msk [vmem:[%s5084_s11 + $0xa8] sm:$0xff] %vm567_vm0, %v2598_v39 }
 0x2c5   : > { %v2995_v18 = vpop.f32.mrf.mxu1 }
 0x2c6   : > { %v2555_v33 = vadd.f32 %v2995_v18, %v5077_v12 }
 0x2c7   : > { %v2546_v60 = vpop.f32.mrf.mxu1 }
 0x2c8   : > { %v2603_v21 = vadd.f32 %v3139_v29, %v2555_v33  ;;  %v2547_v37 = vadd.f32 %v5077_v12, %v2546_v60 }
 0x2c9   : > { %v2996_v24 = vpop.f32.mrf.mxu1 }
 0x2ca   : > { %2635 = vst.msk [vmem:[%s5084_s11 + $0xd0] sm:$0xff] %vm567_vm0, %v2603_v21  ;;  %v2601_v36 = vadd.f32 %v3140_v40, %v2547_v37  ;;  %v2558_v41 = vadd.f32 %v2996_v24, %v5077_v12 }
 0x2cb   : > { %v2549_v31 = vpop.f32.mrf.mxu1 }
 0x2cc   : > { %2633 = vst.msk [vmem:[%s5084_s11 + $0xc0] sm:$0xff] %vm567_vm0, %v2601_v36  ;;  %v2604_v5 = vadd.f32 %v3141_v26, %v2558_v41  ;;  %v2550_v30 = vadd.f32 %v5077_v12, %v2549_v31 }
 0x2ce   : > { %2636 = vst.msk [vmem:[%s5084_s11 + $0xd8] sm:$0xff] %vm567_vm0, %v2604_v5  ;;  %v2602_v9 = vadd.f32 %v3142_v25, %v2550_v30 }
 0x2cf   : > { %v2999_v8 = vpop.f32.mrf.mxu1 }
 0x2d0   : > { %2634 = vst.msk [vmem:[%s5084_s11 + $0xc8] sm:$0xff] %vm567_vm0, %v2602_v9  ;;  %v2571_v43 = vadd.f32 %v2999_v8, %v5077_v12 }
 0x2d1   : > { %v2562_v50 = vpop.f32.mrf.mxu1 }
 0x2d2   : > { %v2607_v7 = vadd.f32 %v3143_v16, %v2571_v43  ;;  %v2563_v62 = vadd.f32 %v5077_v12, %v2562_v50 }
 0x2d3   : > { %v3000_v6 = vpop.f32.mrf.mxu1 }
 0x2d4   : > { %2639 = vst.msk [vmem:[%s5084_s11 + $0xf0] sm:$0xff] %vm567_vm0, %v2607_v7  ;;  %v2605_v51 = vadd.f32 %v3144_v35, %v2563_v62  ;;  %v2574_v46 = vadd.f32 %v3000_v6, %v5077_v12 }
 0x2d5   : > { %v2565_v28 = vpop.f32.mrf.mxu1 }
 0x2d6   : > { %2637 = vst.msk [vmem:[%s5084_s11 + $0xe0] sm:$0xff] %vm567_vm0, %v2605_v51  ;;  %v2608_v63 = vadd.f32 %v3145_v59, %v2574_v46  ;;  %v2566_v4 = vadd.f32 %v5077_v12, %v2565_v28 }
 0x2d8   : > { %2640 = vst.msk [vmem:[%s5084_s11 + $0xf8] sm:$0xff] %vm567_vm0, %v2608_v63  ;;  %v2606_v44 = vadd.f32 %v3146_v45, %v2566_v4 }
 0x2da   : > { %2638 = vst.msk [vmem:[%s5084_s11 + $0xe8] sm:$0xff] %vm567_vm0, %v2606_v44 }
 0x2db   : > { %3244 = shalt.err (!%p3241_p12)
}
 0x2dc   : > { %s3245_s19 = scalar_lea.hbm %s5211_s29, 4096  ;;  %s3249_s22 = scalar_lea.hbm %s5610_s21, 8192 }
 0x2dd   : > { %p3246_p1 = scmp.ne.s32.totalorder %s5211_s29, %s3245_s19  ;;  %p3250_p6 = scmp.lt.s32.totalorder %s5211_s29, %s5610_s21 }
 0x2de   : > { %p3251_p7 = scmp.lt.s32.totalorder %s3249_s22, %s3245_s19 }
 0x2df   : > { %p3247_p2 = pnand %p3246_p1, %p3431_p9 }
 0x2e0   : > { %p3252_p8 = por %p3251_p7, %p3250_p6 }
 0x2e1   : > { %p3248_p5 = pneg %p3247_p2 }
 0x2e3   : > { %p3253_p0 = pnand %p3252_p8, %p3248_p5 }
 0x2e5   : > { %3256 = shalt.err (!%p3253_p0)
}
 0x2e6   : > { %s3324_s9 = smov 128   ;;  %s3325_s11 = smov 8  }
 0x2e7   : > { %3023 = dma.vmem_to_hbm [thread:$0]  (%p3431_p9), %s5213_s24, 4096, %s5211_s29, %s2642_s12, %s3324_s9, %s3324_s9, %s3325_s11  }
 0x2e8 PF: > { %s5611_s13 = sld [smem:[#allocation13_spill]]  ;;  %p5613_p3 = scmp.ge.s32.totalorder %s3315_s14, 2 }
 0x2ea   : > { %p3036_p4 = pnand %p5613_p3, %p3438_p11 }
 0x2ec   : > { %p3037_p10 = pneg %p3036_p4 }
 0x2ee   : > { %s2673_s15 = sand.u32 1, %s5611_s13  }
 0x2ef   : > { %s2674_s18 = scalar_lea.sflag [#allocation5], %s2673_s15 }
 0x2f0   : > { %3290 = dma.done.wait (%p3037_p10), %s2674_s18, 4096  }
 0x2f1   : > { %3292 = vsyncadd (%p3037_p10), %s2674_s18, 4294963200  ;;  %s28_s14 = sadd.s32 1, %s3315_s14   ;;  %s5614_s17 = sld [smem:[#allocation14_spill]] }
 0x2f2   : > { %p25_p13 = scmp.ge.s32.totalorder %s28_s14, 4   ;;  %s5615_s11 = sld [smem:[#allocation18_spill]] }
 0x2f3   : > { %s5616_s12 = sld [smem:[#allocation15_spill]]  ;;  %s5618_s30 = smov %s3299_s10 }
 0x2f4   : > { %s5617_s13 = sld [smem:[#allocation16_spill]]  ;;  %27 = sbr.rel (!%p25_p13) target bundleno = 11 (0xb), region = 129 }
 0x2f7   : > { %s5619_s10 = smov %s5614_s17 }
 0x2f9   :  { %2679 = vsyncpa [#allocation4], 1 }
 0x2fa   :  { %2681 = vsyncpa [#allocation4 + $0x1], 1 }
 0x2fb   :  { %2682 = vsyncpa [#allocation7], 1 }
 0x2fc   :  { %2684 = vsyncpa [#allocation7 + $0x1], 1 }
 0x2fd   :  { %2685 = vsyncpa [#allocation5], 1 }
 0x2fe   :  { %2687 = vsyncpa [#allocation5 + $0x1], 1 }

</bundles_post_ra>
